<compile_context>
chip_gen: v6e
topology: v6e:2x2x1
jax: 0.10.0
libtpu: 0.0.40
codegen_flags: <defaults>
</compile_context>

<pallas_src>
import jax
import jax.numpy as jnp
from jax import lax
from jax.experimental import pallas as pl
from jax.experimental.pallas import tpu as pltpu


def make_cnn_kernel(B, F, S, H, W):
    """Builds the Pallas kernel body for fixed static dims."""
    H2, W2 = H - 2, W - S + 1          # after conv2 (3, S), VALID
    Wp1 = W2 // 2                      # after pool1 (1, 2), floor
    H3 = H2 - 2                        # after conv3 (3, 1), VALID
    Wp2 = Wp1 // 2                     # after pool2 (1, 2), floor
    BH = B * H
    PAD = 8                            # zero rows appended to x / pool1 output

    def kernel(x_ref, w1_ref, b1_ref, w2_ref, b2_ref, w3_ref, b3_ref,
               fcw_ref, sel_ref, fcb_ref, out_ref):
        # ---- conv1 (1x1, Cin=1 -> F) + ReLU; rows = flat (w, b, h) ---------
        y1 = jnp.maximum(x_ref[...] * w1_ref[...] + b1_ref[...], 0.0)  # (W*BH+PAD, F)

        # ---- conv2 (3, S) VALID: im2col (contiguous row-shifted slabs) + MXU
        slabs2 = [y1[kw * BH + kh: kw * BH + kh + W2 * BH, :]
                  for kh in range(3) for kw in range(S)]
        p2 = jnp.concatenate(slabs2, axis=1)                    # (W2*BH, 3*S*F)
        y2 = jnp.maximum(
            jnp.dot(p2, w2_ref[...], preferred_element_type=jnp.float32)
            + b2_ref[...], 0.0)                                 # (W2*BH, F)

        # ---- pool1 (1, 2): pair-max over w row blocks (register resident) --
        pooled1 = [jnp.maximum(y2[(2 * j) * BH:(2 * j + 1) * BH, :],
                               y2[(2 * j + 1) * BH:(2 * j + 2) * BH, :])
                   for j in range(Wp1)]
        p1 = jnp.concatenate(pooled1 + [jnp.zeros((PAD, F), jnp.float32)],
                             axis=0)                            # (Wp1*BH+PAD, F)

        # ---- conv3 (3, 1) VALID: im2col + MXU ------------------------------
        slabs3 = [p1[kh: kh + Wp1 * BH, :] for kh in range(3)]
        p3 = jnp.concatenate(slabs3, axis=1)                    # (Wp1*BH, 3*F)
        y3 = jnp.maximum(
            jnp.dot(p3, w3_ref[...], preferred_element_type=jnp.float32)
            + b3_ref[...], 0.0)                                 # (Wp1*BH, F)

        # ---- pool2 (1, 2): pair-max over w row blocks ----------------------
        pooled2 = [jnp.maximum(y3[(2 * j) * BH:(2 * j + 1) * BH, :],
                               y3[(2 * j + 1) * BH:(2 * j + 2) * BH, :])
                   for j in range(Wp2)]
        p2f = jnp.concatenate(pooled2, axis=0) if Wp2 > 1 else pooled2[0]

        # ---- flatten + dropout(identity) + fc + sigmoid, fused -------------
        # TODO(synk): nn.Dropout treated as identity (eval-mode forward only).
        prod = p2f * fcw_ref[...]                               # (Wp2*BH, F)
        zbf = jnp.dot(sel_ref[...], prod,
                      preferred_element_type=jnp.float32)       # (B, F)
        z = jnp.sum(zbf, axis=1, keepdims=True) + fcb_ref[...]  # (B, 1)
        out_ref[...] = 1.0 / (1.0 + jnp.exp(-z))                # sigmoid

    return kernel


def cnn_forward_pallas(x_nchw, params):
    """params follow the PyTorch layouts:
       w1:(F,1,1,1) b1:(F,) w2:(F,F,3,S) b2:(F,) w3:(F,F,3,1) b3:(F,)
       fc_w:(1, F*H3*Wp2) fc_b:(1,)"""
    w1, b1, w2, b2, w3, b3, fc_w, fc_b = params
    B, C, H, W = x_nchw.shape
    assert C == 1
    F = w1.shape[0]
    S = w2.shape[3]
    H2, W2 = H - 2, W - S + 1
    Wp1 = W2 // 2
    H3 = H2 - 2
    Wp2 = Wp1 // 2
    assert fc_w.shape[1] == F * H3 * Wp2, "fc input dim does not match flatten size"

    f32 = jnp.float32
    BH = B * H
    PAD = 8

    # input: (B,1,H,W) -> flat rows r = w*B*H + b*H + h, single lane; + PAD zeros
    x_flat = jnp.transpose(x_nchw.reshape(B, H, W).astype(f32),
                           (2, 0, 1)).reshape(W * BH, 1)
    x_flat = jnp.concatenate([x_flat, jnp.zeros((PAD, 1), f32)], axis=0)

    w1_k = w1.reshape(1, F).astype(f32)
    b1_k = b1.reshape(1, F).astype(f32)
    # im2col weights: row index = kh*S*F + kw*F + c_in, col = f_out (lane dense)
    w2_k = jnp.transpose(w2.astype(f32), (2, 3, 1, 0)).reshape(3 * S * F, F)
    b2_k = b2.reshape(1, F).astype(f32)
    w3_k = jnp.transpose(w3[:, :, :, 0].astype(f32), (2, 1, 0)).reshape(3 * F, F)
    b3_k = b3.reshape(1, F).astype(f32)

    # fc weight scattered into the kernel's flat (wp2, b, h) row layout,
    # zero at padded h >= H3 rows, replicated across b.
    fcw = jnp.transpose(fc_w.reshape(F, H3, Wp2).astype(f32), (2, 1, 0))  # (Wp2,H3,F)
    fcw = jnp.pad(fcw, ((0, 0), (0, H - H3), (0, 0)))                     # (Wp2,H,F)
    fcw_k = jnp.broadcast_to(fcw[:, None], (Wp2, B, H, F)).reshape(Wp2 * BH, F)

    # per-sample row selector (B, Wp2*B*H): 1 where the row belongs to sample b
    # and is a valid (h < H3) flatten position; masks the garbage rows.
    valid_h = (jnp.arange(H) < H3).astype(f32)                            # (H,)
    sel = jnp.eye(B, dtype=f32)[:, :, None] * valid_h[None, None, :]      # (B,B,H)
    sel_k = jnp.broadcast_to(sel[:, None], (B, Wp2, B, H)).reshape(B, Wp2 * BH)

    fcb_k = fc_b.reshape(1, 1).astype(f32)

    kernel = make_cnn_kernel(B, F, S, H, W)
    operands = (x_flat, w1_k, b1_k, w2_k, b2_k, w3_k, b3_k, fcw_k, sel_k, fcb_k)

    def full_spec(shape):
        nd = len(shape)
        return pl.BlockSpec(shape, lambda i, nd=nd: (0,) * nd)

    return pl.pallas_call(
        kernel,
        out_shape=jax.ShapeDtypeStruct((B, 1), jnp.float32),
        grid=(1,),
        in_specs=[full_spec(op.shape) for op in operands],
        out_specs=full_spec((B, 1)),
        compiler_params=pltpu.CompilerParams(dimension_semantics=("arbitrary",)),
    )(*operands)


def cnn_forward_ref(x, params):
    """Pure-JAX reference mirroring the PyTorch forward (eval mode)."""
    w1, b1, w2, b2, w3, b3, fc_w, fc_b = params
    dn = ("NCHW", "OIHW", "NCHW")
    y = lax.conv_general_dilated(x, w1, (1, 1), "VALID", dimension_numbers=dn)
    y = jnp.maximum(y + b1[None, :, None, None], 0.0)
    y = lax.conv_general_dilated(y, w2, (1, 1), "VALID", dimension_numbers=dn)
    y = jnp.maximum(y + b2[None, :, None, None], 0.0)
    y = lax.reduce_window(y, -jnp.inf, lax.max, (1, 1, 1, 2), (1, 1, 1, 2), "VALID")
    y = lax.conv_general_dilated(y, w3, (1, 1), "VALID", dimension_numbers=dn)
    y = jnp.maximum(y + b3[None, :, None, None], 0.0)
    y = lax.reduce_window(y, -jnp.inf, lax.max, (1, 1, 1, 2), (1, 1, 1, 2), "VALID")
    y = y.reshape(y.shape[0], -1)                # flatten; dropout = identity
    y = y @ fc_w.T + fc_b
    return 1.0 / (1.0 + jnp.exp(-y))


if __name__ == "__main__":
    # Module hyper-params: CNNModel(number_filter, number_of_stocks, seq_len,
    #                               number_feature, drop)
    number_filter = 8
    number_of_stocks = 4
    seq_len = 8
    number_feature = 4      # not used in forward
    drop = 0.25             # dropout prob; identity in eval mode

    F, S, L = number_filter, number_of_stocks, seq_len
    # Input spatial size chosen so that the flattened conv output matches the
    # fc layer's declared input dim F * (S * L) // 4.
    B, H, W = 2, L + 4, 2 * S            # x: (2, 1, 12, 8)

    key = jax.random.PRNGKey(0)
    ks = jax.random.split(key, 9)
    w1 = 0.3 * jax.random.normal(ks[0], (F, 1, 1, 1), jnp.float32)
    b1 = 0.1 * jax.random.normal(ks[1], (F,), jnp.float32)
    w2 = 0.3 * jax.random.normal(ks[2], (F, F, 3, S), jnp.float32)
    b2 = 0.1 * jax.random.normal(ks[3], (F,), jnp.float32)
    w3 = 0.3 * jax.random.normal(ks[4], (F, F, 3, 1), jnp.float32)
    b3 = 0.1 * jax.random.normal(ks[5], (F,), jnp.float32)
    fc_in = F * (S * L) // 4
    fc_w = 0.3 * jax.random.normal(ks[6], (1, fc_in), jnp.float32)
    fc_b = 0.1 * jax.random.normal(ks[7], (1,), jnp.float32)
    x = jax.random.normal(ks[8], (B, 1, H, W), jnp.float32)

    params = (w1, b1, w2, b2, w3, b3, fc_w, fc_b)

    out = cnn_forward_pallas(x, params)
    out = jax.block_until_ready(out)

    ref = cnn_forward_ref(x, params)
    assert out.shape == (B, 1), out.shape
    if not bool(jnp.allclose(out, ref, atol=1e-4, rtol=1e-4)):
        raise AssertionError(f"mismatch: pallas={out} ref={ref}")
    print("KERNEL_OK")
</pallas_src>

<mosaic_0001>
module attributes {stable_mosaic.version = 11 : i64} {
  func.func @kernel(%arg0: i32, %arg1: memref<200x1xf32, #tpu.memory_space<vmem>>, %arg2: memref<1x8xf32, #tpu.memory_space<vmem>>, %arg3: memref<1x8xf32, #tpu.memory_space<vmem>>, %arg4: memref<96x8xf32, #tpu.memory_space<vmem>>, %arg5: memref<1x8xf32, #tpu.memory_space<vmem>>, %arg6: memref<24x8xf32, #tpu.memory_space<vmem>>, %arg7: memref<1x8xf32, #tpu.memory_space<vmem>>, %arg8: memref<24x8xf32, #tpu.memory_space<vmem>>, %arg9: memref<2x24xf32, #tpu.memory_space<vmem>>, %arg10: memref<1x1xf32, #tpu.memory_space<vmem>>, %arg11: memref<2x1xf32, #tpu.memory_space<vmem>>) attributes {dimension_semantics = [#tpu.dimension_semantics<arbitrary>], iteration_bounds = array<i64: 1>, scalar_prefetch = 0 : i64, scratch_operands = 0 : i64, tpu.core_type = #tpu.core_type<tc>, window_params = [{pipeline_mode = #tpu.pipeline_mode<synchronous>, transform_indices = @transform_0, window_bounds = array<i64: 200, 1>}, {pipeline_mode = #tpu.pipeline_mode<synchronous>, transform_indices = @transform_1, window_bounds = array<i64: 1, 8>}, {pipeline_mode = #tpu.pipeline_mode<synchronous>, transform_indices = @transform_2, window_bounds = array<i64: 1, 8>}, {pipeline_mode = #tpu.pipeline_mode<synchronous>, transform_indices = @transform_3, window_bounds = array<i64: 96, 8>}, {pipeline_mode = #tpu.pipeline_mode<synchronous>, transform_indices = @transform_4, window_bounds = array<i64: 1, 8>}, {pipeline_mode = #tpu.pipeline_mode<synchronous>, transform_indices = @transform_5, window_bounds = array<i64: 24, 8>}, {pipeline_mode = #tpu.pipeline_mode<synchronous>, transform_indices = @transform_6, window_bounds = array<i64: 1, 8>}, {pipeline_mode = #tpu.pipeline_mode<synchronous>, transform_indices = @transform_7, window_bounds = array<i64: 24, 8>}, {pipeline_mode = #tpu.pipeline_mode<synchronous>, transform_indices = @transform_8, window_bounds = array<i64: 2, 24>}, {pipeline_mode = #tpu.pipeline_mode<synchronous>, transform_indices = @transform_9, window_bounds = array<i64: 1, 1>}, {pipeline_mode = #tpu.pipeline_mode<synchronous>, transform_indices = @transform_10, window_bounds = array<i64: 2, 1>}]} {
    %c0 = arith.constant 0 : index
    %c0_0 = arith.constant 0 : index
    %0 = vector.load %arg1[%c0, %c0_0] : memref<200x1xf32, #tpu.memory_space<vmem>>, vector<200x1xf32>
    %c0_1 = arith.constant 0 : index
    %c0_2 = arith.constant 0 : index
    %1 = vector.load %arg2[%c0_1, %c0_2] : memref<1x8xf32, #tpu.memory_space<vmem>>, vector<1x8xf32>
    %2 = vector.broadcast %0 : vector<200x1xf32> to vector<200x8xf32>
    %3 = vector.broadcast %1 : vector<1x8xf32> to vector<200x8xf32>
    %4 = arith.mulf %2, %3 : vector<200x8xf32>
    %c0_3 = arith.constant 0 : index
    %c0_4 = arith.constant 0 : index
    %5 = vector.load %arg3[%c0_3, %c0_4] : memref<1x8xf32, #tpu.memory_space<vmem>>, vector<1x8xf32>
    %6 = vector.broadcast %5 : vector<1x8xf32> to vector<200x8xf32>
    %7 = arith.addf %4, %6 : vector<200x8xf32>
    %cst = arith.constant 0.000000e+00 : f32
    %8 = vector.broadcast %cst : f32 to vector<200x8xf32>
    %9 = arith.maximumf %7, %8 : vector<200x8xf32>
    %10 = vector.extract_strided_slice %9 {offsets = [0, 0], sizes = [120, 8], strides = [1, 1]} : vector<200x8xf32> to vector<120x8xf32>
    %11 = vector.extract_strided_slice %9 {offsets = [24, 0], sizes = [120, 8], strides = [1, 1]} : vector<200x8xf32> to vector<120x8xf32>
    %12 = vector.extract_strided_slice %9 {offsets = [48, 0], sizes = [120, 8], strides = [1, 1]} : vector<200x8xf32> to vector<120x8xf32>
    %13 = vector.extract_strided_slice %9 {offsets = [72, 0], sizes = [120, 8], strides = [1, 1]} : vector<200x8xf32> to vector<120x8xf32>
    %14 = vector.extract_strided_slice %9 {offsets = [1, 0], sizes = [120, 8], strides = [1, 1]} : vector<200x8xf32> to vector<120x8xf32>
    %15 = vector.extract_strided_slice %9 {offsets = [25, 0], sizes = [120, 8], strides = [1, 1]} : vector<200x8xf32> to vector<120x8xf32>
    %16 = vector.extract_strided_slice %9 {offsets = [49, 0], sizes = [120, 8], strides = [1, 1]} : vector<200x8xf32> to vector<120x8xf32>
    %17 = vector.extract_strided_slice %9 {offsets = [73, 0], sizes = [120, 8], strides = [1, 1]} : vector<200x8xf32> to vector<120x8xf32>
    %18 = vector.extract_strided_slice %9 {offsets = [2, 0], sizes = [120, 8], strides = [1, 1]} : vector<200x8xf32> to vector<120x8xf32>
    %19 = vector.extract_strided_slice %9 {offsets = [26, 0], sizes = [120, 8], strides = [1, 1]} : vector<200x8xf32> to vector<120x8xf32>
    %20 = vector.extract_strided_slice %9 {offsets = [50, 0], sizes = [120, 8], strides = [1, 1]} : vector<200x8xf32> to vector<120x8xf32>
    %21 = vector.extract_strided_slice %9 {offsets = [74, 0], sizes = [120, 8], strides = [1, 1]} : vector<200x8xf32> to vector<120x8xf32>
    %22 = tpu.concatenate %10, %11, %12, %13, %14, %15, %16, %17, %18, %19, %20, %21 in 1 : vector<120x8xf32>, vector<120x8xf32>, vector<120x8xf32>, vector<120x8xf32>, vector<120x8xf32>, vector<120x8xf32>, vector<120x8xf32>, vector<120x8xf32>, vector<120x8xf32>, vector<120x8xf32>, vector<120x8xf32>, vector<120x8xf32> -> vector<120x96xf32>
    %c0_5 = arith.constant 0 : index
    %c0_6 = arith.constant 0 : index
    %23 = vector.load %arg4[%c0_5, %c0_6] : memref<96x8xf32, #tpu.memory_space<vmem>>, vector<96x8xf32>
    %cst_7 = arith.constant dense<0.000000e+00> : vector<120x8xf32>
    %24 = tpu.matmul %22, %23, %cst_7 {dimension_numbers = #tpu.dot_dimension_numbers<[1], [0], [0], [1], [0, 0, 1, 1], [], []>} : vector<120x96xf32>, vector<96x8xf32>, vector<120x8xf32> -> vector<120x8xf32>
    %c0_8 = arith.constant 0 : index
    %c0_9 = arith.constant 0 : index
    %25 = vector.load %arg5[%c0_8, %c0_9] : memref<1x8xf32, #tpu.memory_space<vmem>>, vector<1x8xf32>
    %26 = vector.broadcast %25 : vector<1x8xf32> to vector<120x8xf32>
    %27 = arith.addf %24, %26 : vector<120x8xf32>
    %cst_10 = arith.constant 0.000000e+00 : f32
    %28 = vector.broadcast %cst_10 : f32 to vector<120x8xf32>
    %29 = arith.maximumf %27, %28 : vector<120x8xf32>
    %30 = vector.extract_strided_slice %29 {offsets = [0, 0], sizes = [24, 8], strides = [1, 1]} : vector<120x8xf32> to vector<24x8xf32>
    %31 = vector.extract_strided_slice %29 {offsets = [24, 0], sizes = [24, 8], strides = [1, 1]} : vector<120x8xf32> to vector<24x8xf32>
    %32 = arith.maximumf %30, %31 : vector<24x8xf32>
    %33 = vector.extract_strided_slice %29 {offsets = [48, 0], sizes = [24, 8], strides = [1, 1]} : vector<120x8xf32> to vector<24x8xf32>
    %34 = vector.extract_strided_slice %29 {offsets = [72, 0], sizes = [24, 8], strides = [1, 1]} : vector<120x8xf32> to vector<24x8xf32>
    %35 = arith.maximumf %33, %34 : vector<24x8xf32>
    %cst_11 = arith.constant 0.000000e+00 : f32
    %36 = vector.broadcast %cst_11 : f32 to vector<8x8xf32>
    %37 = tpu.concatenate %32, %35, %36 in 0 : vector<24x8xf32>, vector<24x8xf32>, vector<8x8xf32> -> vector<56x8xf32>
    %38 = vector.extract_strided_slice %37 {offsets = [0, 0], sizes = [48, 8], strides = [1, 1]} : vector<56x8xf32> to vector<48x8xf32>
    %39 = vector.extract_strided_slice %37 {offsets = [1, 0], sizes = [48, 8], strides = [1, 1]} : vector<56x8xf32> to vector<48x8xf32>
    %40 = vector.extract_strided_slice %37 {offsets = [2, 0], sizes = [48, 8], strides = [1, 1]} : vector<56x8xf32> to vector<48x8xf32>
    %41 = tpu.concatenate %38, %39, %40 in 1 : vector<48x8xf32>, vector<48x8xf32>, vector<48x8xf32> -> vector<48x24xf32>
    %c0_12 = arith.constant 0 : index
    %c0_13 = arith.constant 0 : index
    %42 = vector.load %arg6[%c0_12, %c0_13] : memref<24x8xf32, #tpu.memory_space<vmem>>, vector<24x8xf32>
    %cst_14 = arith.constant dense<0.000000e+00> : vector<48x8xf32>
    %43 = tpu.matmul %41, %42, %cst_14 {dimension_numbers = #tpu.dot_dimension_numbers<[1], [0], [0], [1], [0, 0, 1, 1], [], []>} : vector<48x24xf32>, vector<24x8xf32>, vector<48x8xf32> -> vector<48x8xf32>
    %c0_15 = arith.constant 0 : index
    %c0_16 = arith.constant 0 : index
    %44 = vector.load %arg7[%c0_15, %c0_16] : memref<1x8xf32, #tpu.memory_space<vmem>>, vector<1x8xf32>
    %45 = vector.broadcast %44 : vector<1x8xf32> to vector<48x8xf32>
    %46 = arith.addf %43, %45 : vector<48x8xf32>
    %cst_17 = arith.constant 0.000000e+00 : f32
    %47 = vector.broadcast %cst_17 : f32 to vector<48x8xf32>
    %48 = arith.maximumf %46, %47 : vector<48x8xf32>
    %49 = vector.extract_strided_slice %48 {offsets = [0, 0], sizes = [24, 8], strides = [1, 1]} : vector<48x8xf32> to vector<24x8xf32>
    %50 = vector.extract_strided_slice %48 {offsets = [24, 0], sizes = [24, 8], strides = [1, 1]} : vector<48x8xf32> to vector<24x8xf32>
    %51 = arith.maximumf %49, %50 : vector<24x8xf32>
    %c0_18 = arith.constant 0 : index
    %c0_19 = arith.constant 0 : index
    %52 = vector.load %arg8[%c0_18, %c0_19] : memref<24x8xf32, #tpu.memory_space<vmem>>, vector<24x8xf32>
    %53 = arith.mulf %51, %52 : vector<24x8xf32>
    %c0_20 = arith.constant 0 : index
    %c0_21 = arith.constant 0 : index
    %54 = vector.load %arg9[%c0_20, %c0_21] : memref<2x24xf32, #tpu.memory_space<vmem>>, vector<2x24xf32>
    %cst_22 = arith.constant dense<0.000000e+00> : vector<2x8xf32>
    %55 = tpu.matmul %54, %53, %cst_22 {dimension_numbers = #tpu.dot_dimension_numbers<[1], [0], [0], [1], [0, 0, 1, 1], [], []>} : vector<2x24xf32>, vector<24x8xf32>, vector<2x8xf32> -> vector<2x8xf32>
    %cst_23 = arith.constant dense<0.000000e+00> : vector<2xf32>
    %56 = vector.multi_reduction <add>, %55, %cst_23 [1] : vector<2x8xf32> to vector<2xf32>
    %57 = vector.shape_cast %56 : vector<2xf32> to vector<2x1xf32>
    %c0_24 = arith.constant 0 : index
    %c0_25 = arith.constant 0 : index
    %58 = vector.load %arg10[%c0_24, %c0_25] : memref<1x1xf32, #tpu.memory_space<vmem>>, vector<1x1xf32>
    %59 = vector.broadcast %58 : vector<1x1xf32> to vector<2x1xf32>
    %60 = arith.addf %57, %59 : vector<2x1xf32>
    %cst_26 = arith.constant 0.000000e+00 : f32
    %61 = vector.broadcast %cst_26 : f32 to vector<2x1xf32>
    %62 = arith.subf %61, %60 : vector<2x1xf32>
    %63 = math.exp %62 : vector<2x1xf32>
    %cst_27 = arith.constant 1.000000e+00 : f32
    %64 = vector.broadcast %cst_27 : f32 to vector<2x1xf32>
    %65 = arith.addf %64, %63 : vector<2x1xf32>
    %cst_28 = arith.constant 1.000000e+00 : f32
    %66 = vector.broadcast %cst_28 : f32 to vector<2x1xf32>
    %67 = arith.divf %66, %65 : vector<2x1xf32>
    %c0_29 = arith.constant 0 : index
    %c0_30 = arith.constant 0 : index
    %68 = vector.load %arg11[%c0_29, %c0_30] : memref<2x1xf32, #tpu.memory_space<vmem>>, vector<2x1xf32>
    tpu.vector_store %arg11[%c0_29, %c0_30], %67 {strides = array<i32>} : memref<2x1xf32, #tpu.memory_space<vmem>>, vector<2x1xf32>,
    return
  }
  func.func @transform_0(%arg0: i32) -> (i32, i32) {
    %c0_i32 = arith.constant 0 : i32
    %c0_i32_0 = arith.constant 0 : i32
    %c0_i32_1 = arith.constant 0 : i32
    return %c0_i32, %c0_i32_0 : i32, i32
  }
  func.func @transform_1(%arg0: i32) -> (i32, i32) {
    %c0_i32 = arith.constant 0 : i32
    %c0_i32_0 = arith.constant 0 : i32
    %c0_i32_1 = arith.constant 0 : i32
    return %c0_i32, %c0_i32_0 : i32, i32
  }
  func.func @transform_2(%arg0: i32) -> (i32, i32) {
    %c0_i32 = arith.constant 0 : i32
    %c0_i32_0 = arith.constant 0 : i32
    %c0_i32_1 = arith.constant 0 : i32
    return %c0_i32, %c0_i32_0 : i32, i32
  }
  func.func @transform_3(%arg0: i32) -> (i32, i32) {
    %c0_i32 = arith.constant 0 : i32
    %c0_i32_0 = arith.constant 0 : i32
    %c0_i32_1 = arith.constant 0 : i32
    return %c0_i32, %c0_i32_0 : i32, i32
  }
  func.func @transform_4(%arg0: i32) -> (i32, i32) {
    %c0_i32 = arith.constant 0 : i32
    %c0_i32_0 = arith.constant 0 : i32
    %c0_i32_1 = arith.constant 0 : i32
    return %c0_i32, %c0_i32_0 : i32, i32
  }
  func.func @transform_5(%arg0: i32) -> (i32, i32) {
    %c0_i32 = arith.constant 0 : i32
    %c0_i32_0 = arith.constant 0 : i32
    %c0_i32_1 = arith.constant 0 : i32
    return %c0_i32, %c0_i32_0 : i32, i32
  }
  func.func @transform_6(%arg0: i32) -> (i32, i32) {
    %c0_i32 = arith.constant 0 : i32
    %c0_i32_0 = arith.constant 0 : i32
    %c0_i32_1 = arith.constant 0 : i32
    return %c0_i32, %c0_i32_0 : i32, i32
  }
  func.func @transform_7(%arg0: i32) -> (i32, i32) {
    %c0_i32 = arith.constant 0 : i32
    %c0_i32_0 = arith.constant 0 : i32
    %c0_i32_1 = arith.constant 0 : i32
    return %c0_i32, %c0_i32_0 : i32, i32
  }
  func.func @transform_8(%arg0: i32) -> (i32, i32) {
    %c0_i32 = arith.constant 0 : i32
    %c0_i32_0 = arith.constant 0 : i32
    %c0_i32_1 = arith.constant 0 : i32
    return %c0_i32, %c0_i32_0 : i32, i32
  }
  func.func @transform_9(%arg0: i32) -> (i32, i32) {
    %c0_i32 = arith.constant 0 : i32
    %c0_i32_0 = arith.constant 0 : i32
    %c0_i32_1 = arith.constant 0 : i32
    return %c0_i32, %c0_i32_0 : i32, i32
  }
  func.func @transform_10(%arg0: i32) -> (i32, i32) {
    %c0_i32 = arith.constant 0 : i32
    %c0_i32_0 = arith.constant 0 : i32
    %c0_i32_1 = arith.constant 0 : i32
    return %c0_i32, %c0_i32_0 : i32, i32
  }
}

</mosaic_0001>

<bundles_post_ra>
// kernel: tpu_custom_call.1
= control target key start
LH: loop header
LB: loop body
LE: loop exit
PB: predicated region body
PF: predicated region fallthrough
CT: control target
= control target key end

     0   :  { %v1815_v0 = vmov 0   ;;  %s1816_s21 = smov 8   ;;  %s1817_s22 = smov 16   ;;  %vm435_vm0 = vcmask 1046528   ;;  %vm666_vm1 = vcmask 1045504   ;;  %vm1825_vm2 = vmmov 0   ;;  %s3117_s0 = inlined_call_operand.vmem [shape: f32[200,1], index: 0, kind: input, shape index: {}]   ;;  %s3118_s1 = inlined_call_operand.vmem [shape: f32[1,8], index: 1, kind: input, shape index: {}]   ;;  %s3119_s2 = inlined_call_operand.vmem [shape: f32[1,8], index: 2, kind: input, shape index: {}]   ;;  %s3120_s3 = inlined_call_operand.vmem [shape: f32[96,8], index: 3, kind: input, shape index: {}]   ;;  %s3121_s4 = inlined_call_operand.vmem [shape: f32[1,8], index: 4, kind: input, shape index: {}]   ;;  %s3122_s5 = inlined_call_operand.vmem [shape: f32[24,8], index: 5, kind: input, shape index: {}]   ;;  %s3123_s6 = inlined_call_operand.vmem [shape: f32[1,8], index: 6, kind: input, shape index: {}]   ;;  %s3124_s7 = inlined_call_operand.vmem [shape: f32[24,8], index: 7, kind: input, shape index: {}]   ;;  %s3125_s8 = inlined_call_operand.vmem [shape: f32[2,24], index: 8, kind: input, shape index: {}]   ;;  %s3126_s9 = inlined_call_operand.<no memory space> [shape: f32[1,1], index: 9, kind: input, shape index: {}]   ;;  %s3127_s10 = inlined_call_operand.vmem [shape: f32[2,1], index: 10, kind: output, shape index: {}]  }
   0x1   :  { %1808 = vset.pattern.permute.xlu1 %v1815_v0  ;;  %1807 = vset.pattern.permute.xlu0 %v1815_v0  ;;  %v40_v1 = vld [vmem:[%s3117_s0 + $0x18] sm:$0xff]  ;;  %v37_v2 = vld [vmem:[%s3117_s0] sm:$0xff]  ;;  %v38_v4 = vld [vmem:[%s3117_s0 + $0x8] sm:$0xff]  ;;  %s1818_s23 = smov 24   ;;  %s1820_s12 = smov 32   ;;  %vm896_vm3 = vcmask 64512  }
   0x2   :  { %80 = vperm.xlu1 %1808, %v40_v1   ;;  %65 = vperm.xlu0 %1807, %v37_v2   ;;  %v41_v3 = vld [vmem:[%s3117_s0 + $0x20] sm:$0xff]  ;;  %v44_v5 = vld [vmem:[%s3117_s0 + $0x38] sm:$0xff]  ;;  %v43_v6 = vld [vmem:[%s3117_s0 + $0x30] sm:$0xff]  ;;  %s1821_s15 = smov 40   ;;  %s1822_s20 = smov 48   ;;  %vm912_vm4 = vcmask 130048  }
   0x3   :  { %v47_v7 = vld [vmem:[%s3117_s0 + $0x50] sm:$0xff]  ;;  %v46_v8 = vld [vmem:[%s3117_s0 + $0x48] sm:$0xff]  ;;  %v48_v11 = vld [vmem:[%s3117_s0 + $0x58] sm:$0xff]  ;;  %s1823_s26 = smov 72   ;;  %s1824_s27 = smov 56   ;;  %vm928_vm5 = vcmask 195584  }
   0x4   :  { %v42_v9 = vld [vmem:[%s3117_s0 + $0x28] sm:$0xff]  ;;  %v39_v10 = vld [vmem:[%s3117_s0 + $0x10] sm:$0xff]  ;;  %v45_v12 = vld [vmem:[%s3117_s0 + $0x40] sm:$0xff]  ;;  %s1826_s13 = smov 64   ;;  %s1827_s17 = smov 88   ;;  %vm944_vm6 = vcmask 261120  }
   0x5   :  { %v50_v13 = vld [vmem:[%s3117_s0 + $0x68] sm:$0xff]  ;;  %v49_v14 = vld [vmem:[%s3117_s0 + $0x60] sm:$0xff]  ;;  %v52_v15 = vld [vmem:[%s3117_s0 + $0x78] sm:$0xff]  ;;  %s1828_s24 = smov 80   ;;  %vm960_vm7 = vcmask 326656   ;;  %vm976_vm8 = vcmask 392192  }
   0x6   :  { %85 = vperm.xlu1 %1808, %v41_v3   ;;  %70 = vperm.xlu0 %1807, %v38_v4   ;;  %v51_v16 = vld [vmem:[%s3117_s0 + $0x70] sm:$0xff]  ;;  %v54_v17 = vld [vmem:[%s3117_s0 + $0x88] sm:$0xff]  ;;  %v53_v18 = vld [vmem:[%s3117_s0 + $0x80] sm:$0xff]  ;;  %vm992_vm9 = vcmask 457728   ;;  %vm1008_vm10 = vcmask 523264   ;;  %vm1024_vm11 = vcmask 588800  }
   0x7   :  { %v56_v19 = vld [vmem:[%s3117_s0 + $0x98] sm:$0xff]  ;;  %v55_v20 = vld [vmem:[%s3117_s0 + $0x90] sm:$0xff]  ;;  %v58_v21 = vld [vmem:[%s3117_s0 + $0xa8] sm:$0xff]  ;;  %vm1040_vm12 = vcmask 654336   ;;  %vm1056_vm13 = vcmask 719872   ;;  %vm1091_vm14 = vcmask 785408  }
   0x8   :  { %v57_v22 = vld [vmem:[%s3117_s0 + $0xa0] sm:$0xff]  ;;  %vm1585_vm15 = vcmask 58368  }
   0x9   :  { %v1953_v23 = vld [vmem:[%s3118_s1] ss:$0 sm:$0xff] }
   0xa   :  { %100 = vperm.xlu1 %1808, %v44_v5   ;;  %95 = vperm.xlu0 %1807, %v43_v6   ;;  %v1958_v24 = vld [vmem:[%s3119_s2] ss:$0 sm:$0xff] }
   0xe   :  { %115 = vperm.xlu1 %1808, %v47_v7   ;;  %110 = vperm.xlu0 %1807, %v46_v8  }
  0x12   :  { %90 = vperm.xlu1 %1808, %v42_v9   ;;  %75 = vperm.xlu0 %1807, %v39_v10  }
  0x16   :  { %120 = vperm.xlu1 %1808, %v48_v11   ;;  %105 = vperm.xlu0 %1807, %v45_v12   ;;  %v1083_v11 = vld [vmem:[%s3120_s3 + $0x58] sm:$0xff] }
  0x1a   :  { %130 = vperm.xlu1 %1808, %v50_v13   ;;  %125 = vperm.xlu0 %1807, %v49_v14   ;;  %v3128_v13 = vmov 0.0  }
  0x1b   :  { %1676 = vmatprep.subr.mxu0 %v3128_v13  ;;  %1769 = vmatprep.subr.mxu1 %v3128_v13 }
  0x1c   :  { %1677 = vmatpush3.msra.mxu0 %v1083_v11  ;;  %1781 = vmatpush3.msra.mxu1 %v1083_v11 }
  0x1d   :  { %1678 = vmatprep.subr.mxu0 %v3128_v13  ;;  %1770 = vmatprep.subr.mxu1 %v3128_v13 }
  0x1e   :  { %140 = vperm.xlu1 %1808, %v52_v15   ;;  %135 = vperm.xlu0 %1807, %v51_v16   ;;  %v1082_v15 = vld [vmem:[%s3120_s3 + $0x50] sm:$0xff] }
  0x1f   :  { %1679 = vmatpush3.msra.mxu0 %v1082_v15  ;;  %1782 = vmatpush3.msra.mxu1 %v1082_v15 }
  0x20   :  { %1680 = vmatprep.subr.mxu0 %v3128_v13  ;;  %1771 = vmatprep.subr.mxu1 %v3128_v13 }
  0x21   :  { %1700 = vmatprep.mubr.msk.f32.mxu0 %vm1825_vm2, %v3128_v13  ;;  %1730 = vmatprep.mubr.msk.f32.mxu1 %vm1825_vm2, %v3128_v13 }
  0x22   :  { %150 = vperm.xlu1 %1808, %v54_v17   ;;  %145 = vperm.xlu0 %1807, %v53_v18   ;;  %v1081_v18 = vld [vmem:[%s3120_s3 + $0x48] sm:$0xff] }
  0x23   :  { %1681 = vmatpush3.msra.mxu0 %v1081_v18  ;;  %1783 = vmatpush3.msra.mxu1 %v1081_v18 }
  0x24   :  { %1682 = vmatprep.subr.mxu0 %v3128_v13  ;;  %1772 = vmatprep.subr.mxu1 %v3128_v13 }
  0x26   :  { %160 = vperm.xlu1 %1808, %v56_v19   ;;  %155 = vperm.xlu0 %1807, %v55_v20  }
  0x2a   :  { %170 = vperm.xlu1 %1808, %v58_v21   ;;  %165 = vperm.xlu0 %1807, %v57_v22  }
  0x7d   :  { %v81_v25 = vpop.permute.xlu1 %80  ;;  %v66_v26 = vpop.permute.xlu0 %65 }
  0x7e   :  { %v197_v27 = vmul.f32 %v1953_v23, %v81_v25  ;;  %v194_v1 = vmul.f32 %v1953_v23, %v66_v26 }
  0x80   :  { %v229_v28 = vadd.f32 %v1958_v24, %v197_v27  ;;  %v226_v6 = vadd.f32 %v1958_v24, %v194_v1  ;;  %v1080_v27 = vld [vmem:[%s3120_s3 + $0x40] sm:$0xff] }
  0x81   :  { %v86_v29 = vpop.permute.xlu1 %85  ;;  %v71_v30 = vpop.permute.xlu0 %70  ;;  %1683 = vmatpush3.msra.mxu0 %v1080_v27  ;;  %1784 = vmatpush3.msra.mxu1 %v1080_v27 }
  0x82   :  { %v1962_v31 = vmax.f32 %v229_v28, 0.0  ;;  %v198_v35 = vmul.f32 %v1953_v23, %v86_v29  ;;  %v195_v0 = vmul.f32 %v1953_v23, %v71_v30  ;;  %v2034_v12 = vmax.f32 %v226_v6, 0.0  ;;  %v1079_v29 = vld [vmem:[%s3120_s3 + $0x38] sm:$0xff]  ;;  %1684 = vmatprep.subr.mxu0 %v3128_v13  ;;  %1773 = vmatprep.subr.mxu1 %v3128_v13  ;;  %v1072_v6 = vld [vmem:[%s3120_s3] sm:$0xff] }
  0x83   :  { %1685 = vmatpush3.msra.mxu0 %v1079_v29  ;;  %1785 = vmatpush3.msra.mxu1 %v1079_v29 }
  0x84   :  { %291 = vrot.lane.b32.xlu0 %v1962_v31, %s1816_s21  ;;  %v230_v41 = vadd.f32 %v1958_v24, %v198_v35  ;;  %v227_v5 = vadd.f32 %v1958_v24, %v195_v0  ;;  %v436_v19 = vrot.slane %v2034_v12, 1  ;;  %v441_v25 = vrot.slane %v1962_v31, 1  ;;  %v1078_v35 = vld [vmem:[%s3120_s3 + $0x30] sm:$0xff]  ;;  %1686 = vmatprep.subr.mxu0 %v3128_v13 }
  0x85   :  { %v101_v32 = vpop.permute.xlu1 %100  ;;  %v96_v33 = vpop.permute.xlu0 %95  ;;  %1687 = vmatpush3.msra.mxu0 %v1078_v35  ;;  %1774 = vmatprep.subr.mxu1 %v3128_v13 }
  0x86   :  { %v200_v34 = vmul.f32 %v1953_v23, %v96_v33  ;;  %v201_v43 = vmul.f32 %v1953_v23, %v101_v32  ;;  %v1979_v46 = vmax.f32 %v230_v41, 0.0  ;;  %v2024_v8 = vmax.f32 %v227_v5, 0.0  ;;  %1688 = vmatprep.subr.mxu0 %v3128_v13  ;;  %1786 = vmatpush3.msra.mxu1 %v1078_v35 }
  0x87   :  { %1775 = vmatprep.subr.mxu1 %v3128_v13 }
  0x88   :  { %v232_v36 = vadd.f32 %v1958_v24, %v200_v34  ;;  %v233_v47 = vadd.f32 %v1958_v24, %v201_v43  ;;  %v437_v17 = vrot.slane %v2024_v8, 1  ;;  %v443_v26 = vrot.slane %v1979_v46, 1  ;;  %v1077_v43 = vld [vmem:[%s3120_s3 + $0x28] sm:$0xff] }
  0x89   :  { %v111_v37 = vpop.permute.xlu0 %110  ;;  %v116_v40 = vpop.permute.xlu1 %115  ;;  %1689 = vmatpush3.msra.mxu0 %v1077_v43  ;;  %1787 = vmatpush3.msra.mxu1 %v1077_v43 }
  0x8a   :  { %v1969_v38 = vmax.f32 %v232_v36, 0.0  ;;  %v203_v39 = vmul.f32 %v1953_v23, %v111_v37  ;;  %v204_v50 = vmul.f32 %v1953_v23, %v116_v40  ;;  %v1989_v53 = vmax.f32 %v233_v47, 0.0  ;;  %v1076_v47 = vld [vmem:[%s3120_s3 + $0x20] sm:$0xff]  ;;  %1690 = vmatprep.subr.mxu0 %v3128_v13  ;;  %1776 = vmatprep.subr.mxu1 %v3128_v13 }
  0x8b   :  { %v438_v22 = vsel %vm435_vm0, %v436_v19, %v437_v17  ;;  %v2079_v30 = vsel %vm435_vm0, %v441_v25, %v443_v26  ;;  %v672_v36 = vrot.slane %v1962_v31, 2  ;;  %v674_v37 = vrot.slane %v1979_v46, 2  ;;  %1691 = vmatpush3.msra.mxu0 %v1076_v47  ;;  %1788 = vmatpush3.msra.mxu1 %v1076_v47 }
  0x8c   :  { %3137 = vst [vmem:[#allocation3_spill] sm:$0xff] %v1969_v38  ;;  %v235_v42 = vadd.f32 %v1958_v24, %v203_v39  ;;  %339 = vrot.lane.b32.xlu1 %v1969_v38, %s1817_s22  ;;  %3139 = vst [vmem:[#allocation5_spill] sm:$0xff] %v1989_v53  ;;  %v236_v55 = vadd.f32 %v1958_v24, %v204_v50  ;;  %v447_v33 = vrot.slane %v1969_v38, 1  ;;  %v449_v34 = vrot.slane %v1989_v53, 1 }
  0x8d   :  { %v76_v44 = vpop.permute.xlu0 %75  ;;  %v91_v48 = vpop.permute.xlu1 %90  ;;  %1692 = vmatprep.subr.mxu0 %v3128_v13  ;;  %1777 = vmatprep.subr.mxu1 %v3128_v13  ;;  %v680_v5 = vrot.slane %v1989_v53, 2 }
  0x8e   :  { %v1977_v45 = vmax.f32 %v235_v42, 0.0  ;;  %v199_v56 = vmul.f32 %v1953_v23, %v91_v48  ;;  %v2000_v60 = vmax.f32 %v236_v55, 0.0  ;;  %v196_v9 = vmul.f32 %v1953_v23, %v76_v44 }
  0x8f   :  { %v2103_v40 = vsel %vm435_vm0, %v447_v33, %v449_v34  ;;  %v668_v44 = vrot.slane %v2024_v8, 2  ;;  %v2124_v48 = vsel %vm666_vm1, %v672_v36, %v674_v37 }
  0x90   :  { %3138 = vst [vmem:[#allocation4_spill] sm:$0xff] %v1977_v45  ;;  %387 = vrot.lane.b32.xlu0 %v1977_v45, %s1818_s23  ;;  %3141 = vst [vmem:[#allocation7_spill] sm:$0xff] %v2000_v60  ;;  %v231_v61 = vadd.f32 %v1958_v24, %v199_v56  ;;  %v228_v16 = vadd.f32 %v1958_v24, %v196_v9  ;;  %v453_v41 = vrot.slane %v1977_v45, 1  ;;  %v455_v42 = vrot.slane %v2000_v60, 1 }
  0x91   :  { %v106_v49 = vpop.permute.xlu0 %105  ;;  %v121_v59 = vpop.permute.xlu1 %120  ;;  %v684_v56 = vrot.slane %v1977_v45, 2 }
  0x92   :  { %v202_v51 = vmul.f32 %v1953_v23, %v106_v49  ;;  %v205_v62 = vmul.f32 %v1953_v23, %v121_v59  ;;  %v2011_v2 = vmax.f32 %v231_v61, 0.0  ;;  %v2056_v21 = vmax.f32 %v228_v16, 0.0  ;;  %v1074_v61 = vld [vmem:[%s3120_s3 + $0x10] sm:$0xff] }
  0x93   :  { %v2131_v49 = vsel %vm435_vm0, %v453_v41, %v455_v42 }
  0x94   :  { %v234_v52 = vadd.f32 %v1958_v24, %v202_v51  ;;  %293 = vrot.lane.b32.xlu0 %v1979_v46, %s1816_s21  ;;  %v237_v3 = vadd.f32 %v1958_v24, %v205_v62  ;;  %v439_v32 = vrot.slane %v2056_v21, 1  ;;  %v667_v51 = vrot.slane %v2034_v12, 2 }
  0x95   :  { %v126_v54 = vpop.permute.xlu0 %125  ;;  %v131_v10 = vpop.permute.xlu1 %130  ;;  %v445_v59 = vrot.slane %v2011_v2, 1  ;;  %v678_v62 = vrot.slane %v1969_v38, 2  ;;  %v676_v19 = vrot.slane %v2011_v2, 2 }
  0x96   :  { %v1993_v57 = vmax.f32 %v234_v52, 0.0  ;;  %v206_v58 = vmul.f32 %v1953_v23, %v126_v54  ;;  %v2022_v7 = vmax.f32 %v237_v3, 0.0  ;;  %v207_v14 = vmul.f32 %v1953_v23, %v131_v10  ;;  %v1075_v52 = vld [vmem:[%s3120_s3 + $0x18] sm:$0xff] }
  0x97   :  { %v440_v39 = vsel %vm435_vm0, %v437_v17, %v439_v32  ;;  %v669_v54 = vsel %vm666_vm1, %v667_v51, %v668_v44  ;;  %1693 = vmatpush3.msra.mxu0 %v1075_v52  ;;  %v2177_v1 = vsel %vm435_vm0, %v443_v26, %v445_v59  ;;  %v670_v3 = vrot.slane %v2056_v21, 2  ;;  %1789 = vmatpush3.msra.mxu1 %v1075_v52 }
  0x98   :  { %3140 = vst [vmem:[#allocation6_spill] sm:$0xff] %v1993_v57  ;;  %341 = vrot.lane.b32.xlu0 %v1989_v53, %s1817_s22  ;;  %343 = vrot.lane.b32.xlu1 %v1993_v57, %s1817_s22  ;;  %v238_v63 = vadd.f32 %v1958_v24, %v206_v58  ;;  %3142 = vst [vmem:[#allocation8_spill] sm:$0xff] %v2022_v7  ;;  %v239_v20 = vadd.f32 %v1958_v24, %v207_v14  ;;  %v451_v50 = vrot.slane %v1993_v57, 1 }
  0x99   :  { %v686_v58 = vrot.slane %v2000_v60, 2  ;;  %1694 = vmatprep.subr.mxu0 %v3128_v13  ;;  %1778 = vmatprep.subr.mxu1 %v3128_v13  ;;  %v671_v9 = vsel %vm666_vm1, %v668_v44, %v670_v3  ;;  %v2193_v10 = vsel %vm666_vm1, %v678_v62, %v680_v5  ;;  %v457_v11 = vrot.slane %v2022_v7, 1  ;;  %v136_v35 = vpop.permute.xlu0 %135 }
  0x9a   :  { %v2014_v4 = vmax.f32 %v238_v63, 0.0  ;;  %v2069_v28 = vmax.f32 %v239_v20, 0.0  ;;  %v2151_v55 = vsel %vm435_vm0, %v449_v34, %v451_v50  ;;  %1695 = vmatpush3.msra.mxu0 %v1074_v61  ;;  %v1073_v63 = vld [vmem:[%s3120_s3 + $0x8] sm:$0xff]  ;;  %1790 = vmatpush3.msra.mxu1 %v1074_v61  ;;  %v448_v14 = vsel %vm435_vm0, %v445_v59, %v447_v33 }
  0x9b   :  { %v2172_v0 = vsel %vm666_vm1, %v684_v56, %v686_v58  ;;  %1696 = vmatprep.subr.mxu0 %v3128_v13  ;;  %1779 = vmatprep.subr.mxu1 %v3128_v13  ;;  %v2209_v15 = vsel %vm435_vm0, %v455_v42, %v457_v11  ;;  %v682_v16 = vrot.slane %v1993_v57, 2  ;;  %v442_v18 = vsel %vm435_vm0, %v439_v32, %v441_v25 }
  0x9c   :  { %389 = vrot.lane.b32.xlu0 %v2000_v60, %s1818_s23  ;;  %297 = vrot.lane.b32.xlu1 %v1969_v38, %s1816_s21  ;;  %v459_v20 = vrot.slane %v2014_v4, 1  ;;  %v2242_v25 = vsel %vm435_vm0, %v451_v50, %v453_v41  ;;  %v688_v27 = vrot.slane %v2022_v7, 2  ;;  %v2253_v32 = vsel %vm666_vm1, %v676_v19, %v678_v62 }
  0x9d   :  { %1697 = vmatpush3.msra.mxu0 %v1073_v63  ;;  %1791 = vmatpush3.msra.mxu1 %v1073_v63  ;;  %v2216_v17 = vsel %vm666_vm1, %v680_v5, %v682_v16  ;;  %v673_v33 = vsel %vm666_vm1, %v670_v3, %v672_v36  ;;  %v690_v34 = vrot.slane %v2014_v4, 2  ;;  %v2277_v36 = vsel %vm666_vm1, %v682_v16, %v684_v56  ;;  %v146_v44 = vpop.permute.xlu0 %145 }
  0x9e   :  { %1698 = vmatprep.subr.mxu0 %v3128_v13  ;;  %1780 = vmatprep.subr.mxu1 %v3128_v13  ;;  %v2232_v26 = vsel %vm435_vm0, %v457_v11, %v459_v20  ;;  %v2250_v29 = vsel %vm666_vm1, %v686_v58, %v688_v27 }
  0x9f   :  { %1699 = vmatpush3.msra.mxu0 %v1072_v6  ;;  %1792 = vmatpush3.msra.mxu1 %v1072_v6 }
  0xa0   :  { %295 = vrot.lane.b32.xlu0 %v2011_v2, %s1816_s21  ;;  %393 = vrot.lane.b32.xlu1 %v2014_v4, %s1818_s23 }
  0xa1   :  { %v2306_v51 = vpop.permute.xlu0 %155 }
  0xa4   :  { %391 = vrot.lane.b32.xlu0 %v2022_v7, %s1818_s23  ;;  %347 = vrot.lane.b32.xlu1 %v2000_v60, %s1817_s22 }
  0xa5   :  { %v2318_v56 = vpop.permute.xlu0 %165 }
  0xa8   :  { %345 = vrot.lane.b32.xlu0 %v1977_v45, %s1817_s22  ;;  %301 = vrot.lane.b32.xlu1 %v1993_v57, %s1816_s21 }
  0xac   :  { %299 = vrot.lane.b32.xlu0 %v1989_v53, %s1816_s21  ;;  %467 = vrot.lane.b32.xlu1 %v438_v22, %s1820_s12  ;;  %v677_v22 = vsel %vm666_vm1, %v674_v37, %v676_v19  ;;  %v208_v37 = vmul.f32 %v1953_v23, %v136_v35 }
  0xae   :  { %v240_v41 = vadd.f32 %v1958_v24, %v208_v37 }
  0xb0   :  { %395 = vrot.lane.b32.xlu0 %v2069_v28, %s1818_s23  ;;  %518 = vrot.lane.b32.xlu1 %v2079_v30, %s1821_s15  ;;  %v2292_v43 = vmax.f32 %v240_v41, 0.0 }
  0xb2   :  { %v463_v47 = vrot.slane %v2292_v43, 1  ;;  %v694_v11 = vrot.slane %v2292_v43, 2 }
  0xb4   :  { %469 = vrot.lane.b32.xlu0 %v440_v39, %s1820_s12  ;;  %569 = vrot.lane.b32.xlu1 %v2103_v40, %s1822_s20  ;;  %v461_v39 = vrot.slane %v2069_v28, 1 }
  0xb6   :  { %v2286_v42 = vsel %vm435_vm0, %v459_v20, %v461_v39  ;;  %v2304_v50 = vsel %vm435_vm0, %v461_v39, %v463_v47 }
  0xb8   :  { %749 = vrot.lane.b32.xlu0 %v2124_v48, %s1823_s26  ;;  %621 = vrot.lane.b32.xlu1 %v2131_v49, %s1824_s27 }
  0xbc   :  { %571 = vrot.lane.b32.xlu0 %v2151_v55, %s1822_s20  ;;  %698 = vrot.lane.b32.xlu1 %v669_v54, %s1826_s13  ;;  %v692_v54 = vrot.slane %v2069_v28, 2 }
  0xbe   :  { %v2321_v58 = vsel %vm666_vm1, %v690_v34, %v692_v54 }
  0xc0   :  { %851 = vrot.lane.b32.xlu0 %v2172_v0, %s1827_s17  ;;  %520 = vrot.lane.b32.xlu1 %v2177_v1, %s1821_s15 }
  0xc4   :  { %700 = vrot.lane.b32.xlu0 %v671_v9, %s1826_s13  ;;  %800 = vrot.lane.b32.xlu1 %v2193_v10, %s1828_s24 }
  0xc8   :  { %522 = vrot.lane.b32.xlu0 %v448_v14, %s1821_s15  ;;  %623 = vrot.lane.b32.xlu1 %v2209_v15, %s1824_s27 }
  0xcc   :  { %802 = vrot.lane.b32.xlu0 %v2216_v17, %s1828_s24  ;;  %471 = vrot.lane.b32.xlu1 %v442_v18, %s1820_s12  ;;  %v2358_v18 = vsel %vm666_vm1, %v692_v54, %v694_v11 }
  0xd0   :  { %751 = vrot.lane.b32.xlu1 %v677_v22, %s1823_s26  ;;  %625 = vrot.lane.b32.xlu0 %v2232_v26, %s1824_s27 }
  0xd4   :  { %573 = vrot.lane.b32.xlu1 %v2242_v25, %s1822_s20  ;;  %473 = vrot.lane.b32.xlu0 %v2079_v30, %s1820_s12  ;;  %v2267_v30 = vsel %vm666_vm1, %v688_v27, %v690_v34  ;;  %v210_v27 = vmul.f32 %v1953_v23, %v146_v44 }
  0xd6   :  { %v242_v37 = vadd.f32 %v1958_v24, %v210_v27 }
  0xd8   :  { %853 = vrot.lane.b32.xlu1 %v2250_v29, %s1827_s17  ;;  %753 = vrot.lane.b32.xlu0 %v2253_v32, %s1823_s26  ;;  %v2390_v44 = vmax.f32 %v242_v37, 0.0 }
  0xdc   :  { %702 = vrot.lane.b32.xlu1 %v673_v33, %s1826_s13  ;;  %575 = vrot.lane.b32.xlu0 %v2131_v49, %s1822_s20 }
  0xe0   :  { %524 = vrot.lane.b32.xlu1 %v2103_v40, %s1821_s15  ;;  %855 = vrot.lane.b32.xlu0 %v2267_v30, %s1827_s17 }
  0xe4   :  { %804 = vrot.lane.b32.xlu1 %v2277_v36, %s1828_s24  ;;  %704 = vrot.lane.b32.xlu0 %v2124_v48, %s1826_s13  ;;  %v141_v48 = vpop.permute.xlu1 %140 }
  0xe5   :  { %v209_v61 = vmul.f32 %v1953_v23, %v141_v48 }
  0xe7   :  { %v241_v63 = vadd.f32 %v1958_v24, %v209_v61 }
  0xe8   :  { %627 = vrot.lane.b32.xlu1 %v2286_v42, %s1824_s27  ;;  %526 = vrot.lane.b32.xlu0 %v2151_v55, %s1821_s15  ;;  %v2312_v52 = vpop.permute.xlu1 %150 }
  0xe9   :  { %v2344_v5 = vmax.f32 %v241_v63, 0.0 }
  0xeb   :  { %v465_v19 = vrot.slane %v2344_v5, 1  ;;  %v696_v37 = vrot.slane %v2344_v5, 2 }
  0xec   :  { %475 = vrot.lane.b32.xlu1 %v2177_v1, %s1820_s12  ;;  %349 = vrot.lane.b32.xlu0 %v2022_v7, %s1817_s22  ;;  %v2323_v59 = vpop.permute.xlu1 %160 }
  0xed   :  { %v2371_v33 = vsel %vm435_vm0, %v463_v47, %v465_v19 }
  0xf0   :  { %755 = vrot.lane.b32.xlu1 %v2193_v10, %s1823_s26  ;;  %806 = vrot.lane.b32.xlu0 %v2172_v0, %s1828_s24  ;;  %v2336_v1 = vpop.permute.xlu1 %170 }
  0xf4   :  { %577 = vrot.lane.b32.xlu1 %v2209_v15, %s1822_s20  ;;  %629 = vrot.lane.b32.xlu0 %v2304_v50, %s1824_s27 }
  0xf6   :  { %v2330_v62 = vpop.permute.xlu0 %291 }
  0xf8   :  { %397 = vrot.lane.b32.xlu1 %v2292_v43, %s1818_s23  ;;  %477 = vrot.lane.b32.xlu0 %v448_v14, %s1820_s12 }
  0xfc   :  { %857 = vrot.lane.b32.xlu1 %v2321_v58, %s1827_s17  ;;  %303 = vrot.lane.b32.xlu0 %v1977_v45, %s1816_s21 }
  0xfe   :  { %v340_v6 = vpop.permute.xlu1 %339 }
 0x100   :  { %706 = vrot.lane.b32.xlu1 %v677_v22, %s1826_s13  ;;  %757 = vrot.lane.b32.xlu0 %v2216_v17, %s1823_s26 }
 0x102   :  { %v2338_v3 = vpop.permute.xlu0 %387 }
 0x104   :  { %528 = vrot.lane.b32.xlu1 %v2242_v25, %s1821_s15  ;;  %579 = vrot.lane.b32.xlu0 %v2232_v26, %s1822_s20 }
 0x106   :  { %v2346_v9 = vpop.permute.xlu0 %293 }
 0x108   :  { %351 = vrot.lane.b32.xlu1 %v2014_v4, %s1817_s22  ;;  %399 = vrot.lane.b32.xlu0 %v2344_v5, %s1818_s23 }
 0x10a   :  { %v2353_v14 = vpop.permute.xlu1 %343  ;;  %v2355_v16 = vpop.permute.xlu0 %341 }
 0x10c   :  { %808 = vrot.lane.b32.xlu1 %v2250_v29, %s1828_s24  ;;  %859 = vrot.lane.b32.xlu0 %v2358_v18, %s1827_s17 }
 0x10e   :  { %v2365_v20 = vpop.permute.xlu1 %297  ;;  %v2367_v22 = vpop.permute.xlu0 %389 }
 0x110   :  { %631 = vrot.lane.b32.xlu1 %v2371_v33, %s1824_s27  ;;  %708 = vrot.lane.b32.xlu0 %v2253_v32, %s1826_s13 }
 0x112   :  { %v2377_v34 = vpop.permute.xlu1 %393  ;;  %v2379_v35 = vpop.permute.xlu0 %295 }
 0x114   :  { %479 = vrot.lane.b32.xlu1 %v2103_v40, %s1820_s12  ;;  %530 = vrot.lane.b32.xlu0 %v2131_v49, %s1821_s15  ;;  %v3130_v40 = vrot.slane %v2390_v44, 1 }
 0x116   :  { %v2386_v39 = vpop.permute.xlu1 %347  ;;  %v2388_v41 = vpop.permute.xlu0 %391  ;;  %v2410_v61 = vsel %vm435_vm0, %v465_v19, %v3130_v40  ;;  %v2424_v40 = vsel %vm666_vm1, %v694_v11, %v696_v37 }
 0x118   :  { %305 = vrot.lane.b32.xlu1 %v2000_v60, %s1816_s21  ;;  %353 = vrot.lane.b32.xlu0 %v2069_v28, %s1817_s22  ;;  %v211_v60 = vmul.f32 %v1953_v23, %v2312_v52 }
 0x11a   :  { %v2396_v32 = vpop.permute.xlu1 %301  ;;  %v2398_v47 = vpop.permute.xlu0 %345  ;;  %v243_v52 = vadd.f32 %v1958_v24, %v211_v60 }
 0x11c   :  { %759 = vrot.lane.b32.xlu1 %v2277_v36, %s1823_s26  ;;  %810 = vrot.lane.b32.xlu0 %v2267_v30, %s1828_s24 }
 0x11e   :  { %v468_v48 = vpop.permute.xlu1 %467  ;;  %v2405_v54 = vpop.permute.xlu0 %299 }
 0x120   :  { %581 = vrot.lane.b32.xlu1 %v2286_v42, %s1822_s20  ;;  %633 = vrot.lane.b32.xlu0 %v2410_v61, %s1824_s27 }
 0x122   :  { %v519_v63 = vpop.permute.xlu1 %518  ;;  %v2416_v27 = vpop.permute.xlu0 %395 }
 0x124   :  { %401 = vrot.lane.b32.xlu1 %v2390_v44, %s1818_s23  ;;  %481 = vrot.lane.b32.xlu0 %v2151_v55, %s1820_s12  ;;  %v897_v55 = vsel %vm896_vm3, %v2034_v12, %v2330_v62 }
 0x125   :  { %v913_v11 = vsel %vm912_vm4, %v897_v55, %v340_v6 }
 0x126   :  { %v570_v13 = vpop.permute.xlu1 %569  ;;  %v470_v19 = vpop.permute.xlu0 %469 }
 0x128   :  { %861 = vrot.lane.b32.xlu1 %v2424_v40, %s1827_s17  ;;  %307 = vrot.lane.b32.xlu0 %v2022_v7, %s1816_s21  ;;  %v929_v7 = vsel %vm928_vm5, %v913_v11, %v2338_v3 }
 0x129   :  { %v945_v12 = vsel %vm944_vm6, %v929_v7, %v468_v48  ;;  %v743_v48 = vrot.slane %v2390_v44, 2 }
 0x12a   :  { %v622_v45 = vpop.permute.xlu1 %621  ;;  %v750_v57 = vpop.permute.xlu0 %749  ;;  %v961_v62 = vsel %vm960_vm7, %v945_v12, %v519_v63 }
 0x12b   :  { %v977_v60 = vsel %vm976_vm8, %v961_v62, %v570_v13 }
 0x12c   :  { %710 = vrot.lane.b32.xlu1 %v2193_v10, %s1826_s13  ;;  %761 = vrot.lane.b32.xlu0 %v2172_v0, %s1823_s26  ;;  %v2450_v10 = vmax.f32 %v243_v52, 0.0  ;;  %v993_v3 = vsel %vm992_vm9, %v977_v60, %v622_v45  ;;  %v3143_v60 = vmov 0.0  }
 0x12e   :  { %v699_v53 = vpop.permute.xlu1 %698  ;;  %v572_v38 = vpop.permute.xlu0 %571  ;;  %v514_v52 = vrot.slane %v2450_v10, 1 }
 0x12f   :  { %v1009_v7 = vsel %vm1008_vm10, %v993_v3, %v699_v53  ;;  %v2464_v53 = vsel %vm666_vm1, %v696_v37, %v743_v48  ;;  %v898_v37 = vsel %vm896_vm3, %v2024_v8, %v2346_v9  ;;  %v3144_v3 = vrot.slane %v2390_v44, 1 }
 0x130   :  { %532 = vrot.lane.b32.xlu1 %v2209_v15, %s1821_s15  ;;  %583 = vrot.lane.b32.xlu0 %v2304_v50, %s1822_s20  ;;  %v1025_v63 = vsel %vm1024_vm11, %v1009_v7, %v750_v57 }
 0x131   :  { %v2483_v7 = vsel %vm435_vm0, %v3144_v3, %v514_v52 }
 0x132   :  { %v521_v6 = vpop.permute.xlu1 %520  ;;  %v852_v55 = vpop.permute.xlu0 %851 }
 0x134   :  { %355 = vrot.lane.b32.xlu1 %v2292_v43, %s1817_s22  ;;  %403 = vrot.lane.b32.xlu0 %v2450_v10, %s1818_s23 }
 0x136   :  { %v801_v13 = vpop.permute.xlu1 %800  ;;  %v701_v11 = vpop.permute.xlu0 %700 }
 0x137   :  { %v1041_v45 = vsel %vm1040_vm12, %v1025_v63, %v801_v13 }
 0x138   :  { %812 = vrot.lane.b32.xlu1 %v2321_v58, %s1828_s24  ;;  %863 = vrot.lane.b32.xlu0 %v2464_v53, %s1827_s17  ;;  %v1057_v12 = vsel %vm1056_vm13, %v1041_v45, %v852_v55  ;;  %v914_v55 = vsel %vm912_vm4, %v898_v37, %v2355_v16 }
 0x139   :  { %1701 = vmatmul.mubr.msk.f32.vlgmr.msra.gmra.mxu0 %vm1091_vm14, %v1057_v12  ;;  %v930_v13 = vsel %vm928_vm5, %v914_v55, %v2367_v22  ;;  %v213_v22 = vmul.f32 %v1953_v23, %v2323_v59 }
 0x13a   :  { %v624_v57 = vpop.permute.xlu1 %623  ;;  %v523_v62 = vpop.permute.xlu0 %522  ;;  %1703 = vmatprep.mubr.msk.f32.mxu0 %vm1825_vm2, %v3143_v60  ;;  %v946_v8 = vsel %vm944_vm6, %v930_v13, %v470_v19 }
 0x13b   :  { %v962_v45 = vsel %vm960_vm7, %v946_v8, %v521_v6 }
 0x13c   :  { %635 = vrot.lane.b32.xlu1 %v2483_v7, %s1824_s27  ;;  %712 = vrot.lane.b32.xlu0 %v2216_v17, %s1826_s13  ;;  %v978_v16 = vsel %vm976_vm8, %v962_v45, %v572_v38 }
 0x13d   :  { %v994_v17 = vsel %vm992_vm9, %v978_v16, %v624_v57  ;;  %v212_v57 = vmul.f32 %v1953_v23, %v2306_v51 }
 0x13e   :  { %v472_v9 = vpop.permute.xlu1 %471  ;;  %v803_v63 = vpop.permute.xlu0 %802  ;;  %v1010_v19 = vsel %vm1008_vm10, %v994_v17, %v701_v11  ;;  %v745_v17 = vrot.slane %v2450_v10, 2 }
 0x13f   :  { %v244_v13 = vadd.f32 %v1958_v24, %v212_v57 }
 0x140   :  { %483 = vrot.lane.b32.xlu1 %v2242_v25, %s1820_s12  ;;  %311 = vrot.lane.b32.xlu0 %v2069_v28, %s1816_s21  ;;  %v899_v25 = vsel %vm896_vm3, %v2056_v21, %v2379_v35  ;;  %v245_v21 = vadd.f32 %v1958_v24, %v213_v22 }
 0x141   :  { %v915_v59 = vsel %vm912_vm4, %v899_v25, %v2353_v14 }
 0x142   :  { %v752_v12 = vpop.permute.xlu1 %751  ;;  %v626_v37 = vpop.permute.xlu0 %625  ;;  %v931_v35 = vsel %vm928_vm5, %v915_v59, %v2388_v41  ;;  %v2532_v14 = vmax.f32 %v245_v21, 0.0 }
 0x143   :  { %v1026_v3 = vsel %vm1024_vm11, %v1010_v19, %v752_v12  ;;  %v947_v8 = vsel %vm944_vm6, %v931_v35, %v472_v9  ;;  %v2537_v9 = vmax.f32 %v244_v13, 0.0 }
 0x144   :  { %309 = vrot.lane.b32.xlu1 %v2014_v4, %s1816_s21  ;;  %763 = vrot.lane.b32.xlu0 %v2250_v29, %s1823_s26  ;;  %v1042_v55 = vsel %vm1040_vm12, %v1026_v3, %v803_v63  ;;  %v963_v41 = vsel %vm960_vm7, %v947_v8, %v523_v62  ;;  %v214_v8 = vmul.f32 %v1953_v23, %v2318_v56 }
 0x145   :  { %v516_v57 = vrot.slane %v2537_v9, 1 }
 0x146   :  { %v574_v38 = vpop.permute.xlu1 %573  ;;  %v474_v6 = vpop.permute.xlu0 %473 }
 0x147   :  { %v979_v12 = vsel %vm976_vm8, %v963_v41, %v574_v38  ;;  %v2552_v38 = vsel %vm666_vm1, %v743_v48, %v745_v17  ;;  %v2566_v48 = vsel %vm435_vm0, %v514_v52, %v516_v57  ;;  %v900_v52 = vsel %vm896_vm3, %v1962_v31, %v2365_v20 }
 0x148   :  { %534 = vrot.lane.b32.xlu1 %v2232_v26, %s1821_s15  ;;  %359 = vrot.lane.b32.xlu0 %v2390_v44, %s1817_s22  ;;  %v995_v22 = vsel %vm992_vm9, %v979_v12, %v626_v37 }
 0x14a   :  { %v854_v11 = vpop.permute.xlu1 %853  ;;  %v754_v51 = vpop.permute.xlu0 %753 }
 0x14b   :  { %v1058_v45 = vsel %vm1056_vm13, %v1042_v55, %v854_v11 }
 0x14c   :  { %357 = vrot.lane.b32.xlu1 %v2344_v5, %s1817_s22  ;;  %814 = vrot.lane.b32.xlu0 %v2358_v18, %s1828_s24 }
 0x14d   :  { %1704 = vmatmul.mubr.msk.f32.gmra.mxu0 %vm1091_vm14, %v1058_v45 }
 0x14e   :  { %v703_v63 = vpop.permute.xlu1 %702  ;;  %v576_v16 = vpop.permute.xlu0 %575  ;;  %1706 = vmatprep.mubr.msk.f32.mxu0 %vm1825_vm2, %v3143_v60 }
 0x14f   :  { %v1011_v19 = vsel %vm1008_vm10, %v995_v22, %v703_v63 }
 0x150   :  { %585 = vrot.lane.b32.xlu1 %v2371_v33, %s1822_s20  ;;  %407 = vrot.lane.b32.xlu0 %v2532_v14, %s1818_s23  ;;  %v1027_v3 = vsel %vm1024_vm11, %v1011_v19, %v754_v51  ;;  %v563_v19 = vrot.slane %v2532_v14, 1 }
 0x152   :  { %v525_v62 = vpop.permute.xlu1 %524  ;;  %v856_v25 = vpop.permute.xlu0 %855 }
 0x154   :  { %405 = vrot.lane.b32.xlu1 %v2537_v9, %s1818_s23  ;;  %865 = vrot.lane.b32.xlu0 %v2552_v38, %s1827_s17 }
 0x156   :  { %v805_v37 = vpop.permute.xlu1 %804  ;;  %v705_v59 = vpop.permute.xlu0 %704 }
 0x157   :  { %v1043_v21 = vsel %vm1040_vm12, %v1027_v3, %v805_v37  ;;  %v901_v37 = vsel %vm896_vm3, %v1979_v46, %v2405_v54 }
 0x158   :  { %637 = vrot.lane.b32.xlu1 %v2566_v48, %s1824_s27  ;;  %487 = vrot.lane.b32.xlu0 %v2209_v15, %s1820_s12  ;;  %v1059_v35 = vsel %vm1056_vm13, %v1043_v21, %v856_v25  ;;  %v916_v15 = vsel %vm912_vm4, %v900_v52, %v2398_v47  ;;  %v246_v47 = vadd.f32 %v1958_v24, %v214_v8 }
 0x159   :  { %1707 = vmatmul.mubr.msk.f32.gmra.mxu0 %vm1091_vm14, %v1059_v35  ;;  %v917_v46 = vsel %vm912_vm4, %v901_v37, %v2386_v39 }
 0x15a   :  { %v628_v11 = vpop.permute.xlu1 %627  ;;  %v527_v55 = vpop.permute.xlu0 %526  ;;  %1709 = vmatprep.mubr.msk.f32.mxu0 %vm1825_vm2, %v3143_v60  ;;  %v2603_v12 = vmax.f32 %v246_v47, 0.0  ;;  %v933_v54 = vsel %vm928_vm5, %v917_v46, %v2416_v27  ;;  %v215_v47 = vmul.f32 %v1953_v23, %v2336_v1 }
 0x15c   :  { %485 = vrot.lane.b32.xlu1 %v2131_v49, %s1820_s12  ;;  %313 = vrot.lane.b32.xlu0 %v2292_v43, %s1816_s21  ;;  %v932_v49 = vsel %vm928_vm5, %v916_v15, %v2377_v34  ;;  %v565_v25 = vrot.slane %v2603_v12, 1 }
 0x15d   :  { %v948_v31 = vsel %vm944_vm6, %v932_v49, %v474_v6  ;;  %v2649_v49 = vsel %vm435_vm0, %v516_v57, %v563_v19 }
 0x15e   :  { %v476_v51 = vpop.permute.xlu1 %475  ;;  %v2585_v13 = vpop.permute.xlu0 %349  ;;  %v964_v41 = vsel %vm960_vm7, %v948_v31, %v525_v62  ;;  %v747_v31 = vrot.slane %v2537_v9, 2 }
 0x15f   :  { %v949_v8 = vsel %vm944_vm6, %v933_v54, %v476_v51 }
 0x160   :  { %714 = vrot.lane.b32.xlu1 %v2277_v36, %s1826_s13  ;;  %538 = vrot.lane.b32.xlu0 %v2304_v50, %s1821_s15  ;;  %v980_v36 = vsel %vm976_vm8, %v964_v41, %v576_v16  ;;  %v965_v39 = vsel %vm960_vm7, %v949_v8, %v527_v55  ;;  %v2661_v51 = vsel %vm666_vm1, %v745_v17, %v747_v31 }
 0x161   :  { %v996_v34 = vsel %vm992_vm9, %v980_v36, %v628_v11  ;;  %v2632_v11 = vsel %vm435_vm0, %v563_v19, %v565_v25 }
 0x162   :  { %v756_v20 = vpop.permute.xlu1 %755  ;;  %v807_v45 = vpop.permute.xlu0 %806  ;;  %v1012_v6 = vsel %vm1008_vm10, %v996_v34, %v705_v59 }
 0x163   :  { %v1028_v16 = vsel %vm1024_vm11, %v1012_v6, %v756_v20 }
 0x164   :  { %536 = vrot.lane.b32.xlu1 %v2286_v42, %s1821_s15  ;;  %361 = vrot.lane.b32.xlu0 %v2450_v10, %s1817_s22  ;;  %v1044_v3 = vsel %vm1040_vm12, %v1028_v16, %v807_v45 }
 0x166   :  { %v578_v56 = vpop.permute.xlu1 %577  ;;  %v630_v63 = vpop.permute.xlu0 %629 }
 0x167   :  { %v981_v45 = vsel %vm976_vm8, %v965_v39, %v578_v56  ;;  %v247_v56 = vadd.f32 %v1958_v24, %v215_v47  ;;  %v794_v24 = vrot.slane %v2532_v14, 2 }
 0x168   :  { %765 = vrot.lane.b32.xlu1 %v2267_v30, %s1823_s26  ;;  %589 = vrot.lane.b32.xlu0 %v2483_v7, %s1822_s20  ;;  %v997_v57 = vsel %vm992_vm9, %v981_v45, %v630_v63  ;;  %v61_v45 = vld [vmem:[%s3117_s0 + $0xc0] sm:$0xff] }
 0x169   :  { %v2690_v1 = vmax.f32 %v247_v56, 0.0  ;;  %v2698_v19 = vsel %vm666_vm1, %v747_v31, %v794_v24 }
 0x16a   :  { %v2611_v22 = vpop.permute.xlu1 %397  ;;  %v2613_v62 = vpop.permute.xlu0 %477 }
 0x16b   :  { %v567_v37 = vrot.slane %v2690_v1, 1 }
 0x16c   :  { %587 = vrot.lane.b32.xlu1 %v2410_v61, %s1822_s20  ;;  %409 = vrot.lane.b32.xlu0 %v2603_v12, %s1818_s23 }
 0x16e   :  { %v858_v59 = vpop.permute.xlu1 %857  ;;  %v2626_v21 = vpop.permute.xlu0 %303 }
 0x16f   :  { %v1060_v35 = vsel %vm1056_vm13, %v1044_v3, %v858_v59  ;;  %v902_v3 = vsel %vm896_vm3, %v2011_v2, %v2396_v32 }
 0x170   :  { %816 = vrot.lane.b32.xlu1 %v2424_v40, %s1828_s24  ;;  %641 = vrot.lane.b32.xlu0 %v2632_v11, %s1824_s27  ;;  %v918_v59 = vsel %vm912_vm4, %v902_v3, %v2585_v13 }
 0x171   :  { %1710 = vmatmul.mubr.msk.f32.gmra.mxu0 %vm1091_vm14, %v1060_v35  ;;  %v934_v54 = vsel %vm928_vm5, %v918_v59, %v2611_v22 }
 0x172   :  { %v707_v52 = vpop.permute.xlu1 %706  ;;  %v758_v15 = vpop.permute.xlu0 %757  ;;  %1712 = vmatprep.mubr.msk.f32.mxu0 %vm1825_vm2, %v3143_v60  ;;  %v950_v2 = vsel %vm944_vm6, %v934_v54, %v2613_v62 }
 0x173   :  { %v1013_v41 = vsel %vm1008_vm10, %v997_v57, %v707_v52  ;;  %v2721_v52 = vsel %vm435_vm0, %v565_v25, %v567_v37 }
 0x174   :  { %639 = vrot.lane.b32.xlu1 %v2649_v49, %s1824_s27  ;;  %489 = vrot.lane.b32.xlu0 %v2232_v26, %s1820_s12  ;;  %v1029_v17 = vsel %vm1024_vm11, %v1013_v41, %v758_v15  ;;  %v796_v15 = vrot.slane %v2603_v12, 2 }
 0x176   :  { %v529_v27 = vpop.permute.xlu1 %528  ;;  %v580_v20 = vpop.permute.xlu0 %579  ;;  %v2732_v8 = vsel %vm666_vm1, %v794_v24, %v796_v15 }
 0x177   :  { %v966_v22 = vsel %vm960_vm7, %v950_v2, %v529_v27  ;;  %v798_v27 = vrot.slane %v2690_v1, 2 }
 0x178   :  { %867 = vrot.lane.b32.xlu1 %v2661_v51, %s1827_s17  ;;  %718 = vrot.lane.b32.xlu0 %v2250_v29, %s1826_s13  ;;  %v982_v25 = vsel %vm976_vm8, %v966_v22, %v580_v20 }
 0x17a   :  { %v2668_v26 = vpop.permute.xlu1 %351  ;;  %v2670_v55 = vpop.permute.xlu0 %399 }
 0x17c   :  { %716 = vrot.lane.b32.xlu1 %v2172_v0, %s1826_s13  ;;  %767 = vrot.lane.b32.xlu0 %v2321_v58, %s1823_s26 }
 0x17e   :  { %v809_v29 = vpop.permute.xlu1 %808  ;;  %v860_v36 = vpop.permute.xlu0 %859 }
 0x17f   :  { %v1045_v63 = vsel %vm1040_vm12, %v1029_v17, %v809_v29  ;;  %v2754_v17 = vsel %vm666_vm1, %v796_v15, %v798_v27  ;;  %v60_v29 = vld [vmem:[%s3117_s0 + $0xb8] sm:$0xff] }
 0x180   :  { %v1061_v34 = vsel %vm1056_vm13, %v1045_v63, %v860_v36  ;;  %540 = vrot.lane.b32.xlu1 %v2371_v33, %s1821_s15  ;;  %591 = vrot.lane.b32.xlu0 %v2566_v48, %s1822_s20  ;;  %v3145_v36 = vld [vmem:[#allocation3_spill] sm:$0xff] }
 0x181   :  { %1713 = vmatmul.mubr.msk.f32.gmra.mxu0 %vm1091_vm14, %v1061_v34  ;;  %v903_v56 = vsel %vm896_vm3, %v3145_v36, %v2626_v21 }
 0x182   :  { %v632_v23 = vpop.permute.xlu1 %631  ;;  %v709_v0 = vpop.permute.xlu0 %708  ;;  %1715 = vmatprep.mubr.msk.f32.mxu0 %vm1825_vm2, %v3143_v60 }
 0x183   :  { %v998_v39 = vsel %vm992_vm9, %v982_v25, %v632_v23 }
 0x184   :  { %769 = vrot.lane.b32.xlu1 %v2358_v18, %s1823_s26  ;;  %820 = vrot.lane.b32.xlu0 %v2552_v38, %s1828_s24  ;;  %v1014_v57 = vsel %vm1008_vm10, %v998_v39, %v709_v0  ;;  %v919_v0 = vsel %vm912_vm4, %v903_v56, %v2668_v26 }
 0x185   :  { %v935_v3 = vsel %vm928_vm5, %v919_v0, %v2670_v55 }
 0x186   :  { %v480_v6 = vpop.permute.xlu1 %479  ;;  %v531_v16 = vpop.permute.xlu0 %530 }
 0x187   :  { %v951_v54 = vsel %vm944_vm6, %v935_v3, %v480_v6 }
 0x188   :  { %818 = vrot.lane.b32.xlu1 %v2464_v53, %s1828_s24  ;;  %869 = vrot.lane.b32.xlu0 %v2698_v19, %s1827_s17 }
 0x18a   :  { %v2710_v35 = vpop.permute.xlu1 %305  ;;  %v2712_v46 = vpop.permute.xlu0 %353 }
 0x18c   :  { %643 = vrot.lane.b32.xlu1 %v2721_v52, %s1824_s27  ;;  %720 = vrot.lane.b32.xlu0 %v2267_v30, %s1826_s13  ;;  %v59_v30 = vld [vmem:[%s3117_s0 + $0xb0] sm:$0xff] }
 0x18e   :  { %v760_v32 = vpop.permute.xlu1 %759  ;;  %v811_v13 = vpop.permute.xlu0 %810 }
 0x18f   :  { %v1030_v20 = vsel %vm1024_vm11, %v1014_v57, %v760_v32 }
 0x190   :  { %871 = vrot.lane.b32.xlu1 %v2732_v8, %s1827_s17  ;;  %822 = vrot.lane.b32.xlu0 %v2661_v51, %s1828_s24  ;;  %v1046_v63 = vsel %vm1040_vm12, %v1030_v20, %v811_v13 }
 0x192   :  { %v582_v62 = vpop.permute.xlu1 %581  ;;  %v634_v31 = vpop.permute.xlu0 %633 }
 0x194   :  { %771 = vrot.lane.b32.xlu1 %v2424_v40, %s1823_s26  ;;  %175 = vperm.xlu0 %1807, %v59_v30  }
 0x196   :  { %v402_v47 = vpop.permute.xlu1 %401  ;;  %v482_v41 = vpop.permute.xlu0 %481 }
 0x198   :  { %873 = vrot.lane.b32.xlu1 %v2754_v17, %s1827_s17  ;;  %185 = vperm.xlu0 %1807, %v61_v45  }
 0x19a   :  { %v862_v34 = vpop.permute.xlu1 %861  ;;  %v2765_v23 = vpop.permute.xlu0 %307 }
 0x19b   :  { %v1062_v24 = vsel %vm1056_vm13, %v1046_v63, %v862_v34 }
 0x19c   :  { %180 = vperm.xlu1 %1808, %v60_v29   ;;  %363 = vrot.lane.b32.xlu0 %v2537_v9, %s1817_s22  ;;  %v967_v9 = vsel %vm960_vm7, %v951_v54, %v531_v16 }
 0x19d   :  { %1716 = vmatmul.mubr.msk.f32.gmra.mxu0 %vm1091_vm14, %v1062_v24  ;;  %v983_v2 = vsel %vm976_vm8, %v967_v9, %v582_v62  ;;  %v3146_v62 = vld [vmem:[#allocation5_spill] sm:$0xff] }
 0x19e   :  { %v711_v21 = vpop.permute.xlu1 %710  ;;  %v762_v59 = vpop.permute.xlu0 %761  ;;  %1718 = vmatprep.mubr.msk.f32.mxu0 %vm1825_vm2, %v3143_v60  ;;  %v999_v55 = vsel %vm992_vm9, %v983_v2, %v634_v31  ;;  %v904_v31 = vsel %vm896_vm3, %v3146_v62, %v2710_v35 }
 0x19f   :  { %v920_v57 = vsel %vm912_vm4, %v904_v31, %v2712_v46 }
 0x1a0   :  { %315 = vrot.lane.b32.xlu1 %v2344_v5, %s1816_s21  ;;  %491 = vrot.lane.b32.xlu0 %v2286_v42, %s1820_s12  ;;  %v1015_v5 = vsel %vm1008_vm10, %v999_v55, %v711_v21 }
 0x1a1   :  { %v1031_v42 = vsel %vm1024_vm11, %v1015_v5, %v762_v59 }
 0x1a2   :  { %v533_v26 = vpop.permute.xlu1 %532  ;;  %v584_v15 = vpop.permute.xlu0 %583 }
 0x1a4   :  { %411 = vrot.lane.b32.xlu1 %v2690_v1, %s1818_s23  ;;  %542 = vrot.lane.b32.xlu0 %v2410_v61, %s1821_s15 }
 0x1a6   :  { %v356_v6 = vpop.permute.xlu1 %355  ;;  %v404_v32 = vpop.permute.xlu0 %403 }
 0x1a8   :  { %317 = vrot.lane.b32.xlu1 %v2390_v44, %s1816_s21  ;;  %593 = vrot.lane.b32.xlu0 %v2649_v49, %s1822_s20 }
 0x1aa   :  { %v813_v16 = vpop.permute.xlu1 %812  ;;  %v864_v13 = vpop.permute.xlu0 %863 }
 0x1ab   :  { %v1047_v22 = vsel %vm1040_vm12, %v1031_v42, %v813_v16 }
 0x1ac   :  { %v1063_v61 = vsel %vm1056_vm13, %v1047_v22, %v864_v13  ;;  %365 = vrot.lane.b32.xlu1 %v2532_v14, %s1817_s22  ;;  %v936_v14 = vsel %vm928_vm5, %v920_v57, %v402_v47 }
 0x1ad   :  { %1719 = vmatmul.mubr.msk.f32.gmra.mxu0 %vm1091_vm14, %v1063_v61  ;;  %v952_v36 = vsel %vm944_vm6, %v936_v14, %v482_v41 }
 0x1ae   :  { %v636_v30 = vpop.permute.xlu1 %635  ;;  %v713_v25 = vpop.permute.xlu0 %712  ;;  %1721 = vmatprep.mubr.msk.f32.mxu0 %vm1825_vm2, %v3143_v60  ;;  %v968_v56 = vsel %vm960_vm7, %v952_v36, %v533_v26 }
 0x1af   :  { %v984_v0 = vsel %vm976_vm8, %v968_v56, %v584_v15 }
 0x1b0   :  { %v1000_v35 = vsel %vm992_vm9, %v984_v0, %v636_v30 }
 0x1b1   :  { %v1016_v21 = vsel %vm1008_vm10, %v1000_v35, %v713_v25  ;;  %v3147_v25 = vld [vmem:[#allocation6_spill] sm:$0xff] }
 0x1b2   :  { %v484_v44 = vpop.permute.xlu1 %483  ;;  %v2802_v49 = vpop.permute.xlu0 %311  ;;  %v905_v62 = vsel %vm896_vm3, %v3147_v25, %v2765_v23 }
 0x1b3   :  { %v921_v31 = vsel %vm912_vm4, %v905_v62, %v356_v6 }
 0x1b4   :  { %v937_v14 = vsel %vm928_vm5, %v921_v31, %v404_v32 }
 0x1b5   :  { %v953_v36 = vsel %vm944_vm6, %v937_v14, %v484_v44 }
 0x1b6   :  { %v310_v39 = vpop.permute.xlu1 %309  ;;  %v764_v45 = vpop.permute.xlu0 %763 }
 0x1b7   :  { %v1032_v46 = vsel %vm1024_vm11, %v1016_v21, %v764_v45 }
 0x1ba   :  { %v535_v20 = vpop.permute.xlu1 %534  ;;  %v2810_v29 = vpop.permute.xlu0 %359 }
 0x1bb   :  { %v969_v56 = vsel %vm960_vm7, %v953_v36, %v535_v20 }
 0x1be   :  { %v358_v63 = vpop.permute.xlu1 %357  ;;  %v815_v34 = vpop.permute.xlu0 %814 }
 0x1bf   :  { %v1048_v47 = vsel %vm1040_vm12, %v1032_v46, %v815_v34 }
 0x1c2   :  { %v586_v24 = vpop.permute.xlu1 %585  ;;  %v408_v3 = vpop.permute.xlu0 %407 }
 0x1c3   :  { %v985_v34 = vsel %vm976_vm8, %v969_v56, %v586_v24  ;;  %v3148_v24 = vld [vmem:[#allocation4_spill] sm:$0xff] }
 0x1c6   :  { %v406_v59 = vpop.permute.xlu1 %405  ;;  %v866_v54 = vpop.permute.xlu0 %865 }
 0x1c7   :  { %v1064_v41 = vsel %vm1056_vm13, %v1048_v47, %v866_v54 }
 0x1c8   :  { %1722 = vmatmul.mubr.msk.f32.gmra.mxu0 %vm1091_vm14, %v1064_v41  ;;  %v906_v41 = vsel %vm896_vm3, %v3148_v24, %v310_v39 }
 0x1c9   :  { %1724 = vmatprep.mubr.msk.f32.mxu0 %vm1825_vm2, %v3143_v60 }
 0x1ca   :  { %v638_v9 = vpop.permute.xlu1 %637  ;;  %v488_v26 = vpop.permute.xlu0 %487 }
 0x1cb   :  { %v1001_v21 = vsel %vm992_vm9, %v985_v34, %v638_v9  ;;  %v922_v9 = vsel %vm912_vm4, %v906_v41, %v358_v63  ;;  %v3149_v34 = vld [vmem:[#allocation7_spill] sm:$0xff] }
 0x1cc   :  { %v907_v39 = vsel %vm896_vm3, %v3149_v34, %v2802_v49 }
 0x1ce   :  { %v486_v15 = vpop.permute.xlu1 %485  ;;  %v314_v2 = vpop.permute.xlu0 %313 }
 0x1d2   :  { %v715_v55 = vpop.permute.xlu1 %714  ;;  %v539_v5 = vpop.permute.xlu0 %538 }
 0x1d3   :  { %v1017_v46 = vsel %vm1008_vm10, %v1001_v21, %v715_v55  ;;  %v938_v55 = vsel %vm928_vm5, %v922_v9, %v406_v59  ;;  %v923_v59 = vsel %vm912_vm4, %v907_v39, %v2810_v29  ;;  %v1813_v39 = vld [vmem:[%s3118_s1] ss:$0 sm:$0xff] }
 0x1d4   :  { %v954_v62 = vsel %vm944_vm6, %v938_v55, %v486_v15  ;;  %v939_v21 = vsel %vm928_vm5, %v923_v59, %v408_v3  ;;  %v1814_v59 = vld [vmem:[%s3119_s2] ss:$0 sm:$0xff] }
 0x1d6   :  { %v537_v42 = vpop.permute.xlu1 %536  ;;  %v362_v16 = vpop.permute.xlu0 %361 }
 0x1d7   :  { %v970_v31 = vsel %vm960_vm7, %v954_v62, %v537_v42  ;;  %v955_v42 = vsel %vm944_vm6, %v939_v21, %v488_v26 }
 0x1d8   :  { %v971_v49 = vsel %vm960_vm7, %v955_v42, %v539_v5 }
 0x1da   :  { %v766_v13 = vpop.permute.xlu1 %765  ;;  %v590_v22 = vpop.permute.xlu0 %589 }
 0x1db   :  { %v1033_v23 = vsel %vm1024_vm11, %v1017_v46, %v766_v13  ;;  %v987_v3 = vsel %vm976_vm8, %v971_v49, %v590_v22 }
 0x1de   :  { %v588_v61 = vpop.permute.xlu1 %587  ;;  %v410_v30 = vpop.permute.xlu0 %409 }
 0x1e2   :  { %v817_v45 = vpop.permute.xlu1 %816  ;;  %v642_v57 = vpop.permute.xlu0 %641 }
 0x1e3   :  { %v1049_v6 = vsel %vm1040_vm12, %v1033_v23, %v817_v45  ;;  %v986_v45 = vsel %vm976_vm8, %v970_v31, %v588_v61  ;;  %v3150_v23 = vld [vmem:[#allocation8_spill] sm:$0xff] }
 0x1e6   :  { %v640_v0 = vpop.permute.xlu1 %639  ;;  %v490_v35 = vpop.permute.xlu0 %489 }
 0x1e7   :  { %v1002_v14 = vsel %vm992_vm9, %v986_v45, %v640_v0 }
 0x1ea   :  { %v868_v47 = vpop.permute.xlu1 %867  ;;  %v719_v54 = vpop.permute.xlu0 %718 }
 0x1eb   :  { %v1065_v32 = vsel %vm1056_vm13, %v1049_v6, %v868_v47  ;;  %v908_v6 = vsel %vm896_vm3, %v3150_v23, %v314_v2 }
 0x1ec   :  { %1725 = vmatmul.mubr.msk.f32.gmra.mxu0 %vm1091_vm14, %v1065_v32  ;;  %v924_v29 = vsel %vm912_vm4, %v908_v6, %v362_v16 }
 0x1ed   :  { %1727 = vmatprep.mubr.msk.f32.mxu0 %vm1825_vm2, %v3143_v60  ;;  %v940_v26 = vsel %vm928_vm5, %v924_v29, %v410_v30 }
 0x1ee   :  { %v717_v44 = vpop.permute.xlu1 %716  ;;  %v768_v20 = vpop.permute.xlu0 %767  ;;  %v956_v24 = vsel %vm944_vm6, %v940_v26, %v490_v35 }
 0x1ef   :  { %v1018_v63 = vsel %vm1008_vm10, %v1002_v14, %v717_v44 }
 0x1f0   :  { %v1034_v61 = vsel %vm1024_vm11, %v1018_v63, %v768_v20  ;;  %v1003_v20 = vsel %vm992_vm9, %v987_v3, %v642_v57 }
 0x1f1   :  { %v1019_v2 = vsel %vm1008_vm10, %v1003_v20, %v719_v54 }
 0x1f2   :  { %v541_v13 = vpop.permute.xlu1 %540  ;;  %v592_v25 = vpop.permute.xlu0 %591 }
 0x1f3   :  { %v972_v41 = vsel %vm960_vm7, %v956_v24, %v541_v13 }
 0x1f4   :  { %v988_v16 = vsel %vm976_vm8, %v972_v41, %v592_v25 }
 0x1f6   :  { %v770_v36 = vpop.permute.xlu1 %769  ;;  %v821_v56 = vpop.permute.xlu0 %820 }
 0x1f7   :  { %v1035_v9 = vsel %vm1024_vm11, %v1019_v2, %v770_v36 }
 0x1f8   :  { %v1051_v22 = vsel %vm1040_vm12, %v1035_v9, %v821_v56 }
 0x1f9   :  { %v2854_v15 = vpop.f32.mrf.mxu0 }
 0x1fa   :  { %v819_v0 = vpop.permute.xlu1 %818  ;;  %v870_v46 = vpop.permute.xlu0 %869 }
 0x1fb   :  { %v1050_v47 = vsel %vm1040_vm12, %v1034_v61, %v819_v0  ;;  %v1702_v32 = vpop.f32.mrf.mxu0 }
 0x1fc   :  { %v1066_v44 = vsel %vm1056_vm13, %v1050_v47, %v870_v46 }
 0x1fd   :  { %1728 = vmatmul.mubr.msk.f32.gmra.mxu0 %vm1091_vm14, %v1066_v44 }
 0x1fe   :  { %v644_v5 = vpop.permute.xlu1 %643  ;;  %v721_v62 = vpop.permute.xlu0 %720 }
 0x1ff   :  { %v1004_v30 = vsel %vm992_vm9, %v988_v16, %v644_v5 }
 0x200   :  { %v1020_v35 = vsel %vm1008_vm10, %v1004_v30, %v721_v62  ;;  %v1375_v62 = vld [vmem:[%s3122_s5 + $0x10] sm:$0xff] }
 0x201   :  { %1745 = vmatprep.subr.mxu1 %v1375_v62 }
 0x202   :  { %v872_v55 = vpop.permute.xlu1 %871  ;;  %v823_v31 = vpop.permute.xlu0 %822 }
 0x203   :  { %v1067_v57 = vsel %vm1056_vm13, %v1051_v22, %v872_v55 }
 0x204   :  { %1731 = vmatmul.mubr.msk.f32.vlgmr.msra.gmra.mxu1 %vm1091_vm14, %v1067_v57  ;;  %v1374_v57 = vld [vmem:[%s3122_s5 + $0x8] sm:$0xff] }
 0x205   :  { %1733 = vmatprep.mubr.msk.f32.mxu1 %vm1825_vm2, %v3143_v60  ;;  %1746 = vmatpush3.msra.mxu1 %v1375_v62 }
 0x206   :  { %v772_v54 = vpop.permute.xlu1 %771  ;;  %1747 = vmatprep.subr.mxu1 %v1374_v57 }
 0x207   :  { %v1036_v13 = vsel %vm1024_vm11, %v1020_v35, %v772_v54  ;;  %v1373_v35 = vld [vmem:[%s3122_s5] sm:$0xff]  ;;  %1748 = vmatpush3.msra.mxu1 %v1374_v57 }
 0x208   :  { %v1052_v45 = vsel %vm1040_vm12, %v1036_v13, %v823_v31  ;;  %1749 = vmatprep.subr.mxu1 %v1373_v35 }
 0x209   :  { %1750 = vmatpush3.msra.mxu1 %v1373_v35 }
 0x20a   :  { %v874_v25 = vpop.permute.xlu1 %873  ;;  %1760 = vmatprep.subr.mxu1 %v3143_v60 }
 0x20b   :  { %v1068_v14 = vsel %vm1056_vm13, %v1052_v45, %v874_v25 }
 0x20c   :  { %1734 = vmatmul.mubr.msk.f32.gmra.mxu1 %vm1091_vm14, %v1068_v14 }
 0x20d   :  { %v1208_v36 = vpop.f32.mrf.mxu0  ;;  %1736 = vmatprep.mubr.msk.f32.mxu1 %vm1825_vm2, %v3143_v60 }
 0x20f   :  { %v1705_v56 = vpop.f32.mrf.mxu0  ;;  %v176_v34 = vpop.permute.xlu0 %175 }
 0x210   :  { %v216_v63 = vmul.f32 %v1813_v39, %v176_v34 }
 0x212   :  { %v248_v21 = vadd.f32 %v1814_v59, %v216_v63 }
 0x214   :  { %v273_v42 = vmax.f32 %v248_v21, 0.0 }
 0x216   :  { %v615_v61 = vrot.slane %v273_v42, 1  ;;  %413 = vrot.lane.b32.xlu1 %v273_v42, %s1818_s23  ;;  %v845_v32 = vrot.slane %v273_v42, 2 }
 0x217   :  { %v181_v46 = vpop.permute.xlu1 %180 }
 0x218   :  { %v616_v0 = vsel %vm435_vm0, %v567_v37, %v615_v61  ;;  %v217_v49 = vmul.f32 %v1813_v39, %v181_v46 }
 0x219   :  { %v2896_v23 = vpop.f32.mrf.mxu0  ;;  %645 = vrot.lane.b32.xlu0 %v616_v0, %s1824_s27 }
 0x21a   :  { %493 = vrot.lane.b32.xlu1 %v2304_v50, %s1820_s12  ;;  %v249_v47 = vadd.f32 %v1814_v59, %v217_v49 }
 0x21b   :  { %v1708_v6 = vpop.f32.mrf.mxu0  ;;  %v316_v42 = vpop.permute.xlu1 %315 }
 0x21c   :  { %v274_v37 = vmax.f32 %v249_v47, 0.0 }
 0x21d   :  { %722 = vrot.lane.b32.xlu0 %v2321_v58, %s1826_s13  ;;  %v186_v58 = vpop.permute.xlu0 %185 }
 0x21e   :  { %319 = vrot.lane.b32.xlu1 %v2450_v10, %s1816_s21  ;;  %v617_v50 = vrot.slane %v274_v37, 1  ;;  %v847_v1 = vrot.slane %v274_v37, 2 }
 0x21f   :  { %v412_v0 = vpop.permute.xlu1 %411 }
 0x220   :  { %v618_v10 = vsel %vm435_vm0, %v615_v61, %v617_v50 }
 0x221   :  { %544 = vrot.lane.b32.xlu0 %v2483_v7, %s1821_s15  ;;  %v218_v7 = vmul.f32 %v1813_v39, %v186_v58  ;;  %v364_v61 = vpop.permute.xlu0 %363 }
 0x222   :  { %773 = vrot.lane.b32.xlu1 %v2464_v53, %s1823_s26  ;;  %v846_v53 = vsel %vm666_vm1, %v798_v27, %v845_v32 }
 0x225   :  { %367 = vrot.lane.b32.xlu0 %v2603_v12, %s1817_s22  ;;  %v492_v46 = vpop.permute.xlu0 %491 }
 0x226   :  { %595 = vrot.lane.b32.xlu1 %v2632_v11, %s1822_s20  ;;  %v250_v11 = vadd.f32 %v1814_v59, %v218_v7 }
 0x228   :  { %v275_v29 = vmax.f32 %v250_v11, 0.0 }
 0x229   :  { %824 = vrot.lane.b32.xlu0 %v2698_v19, %s1828_s24  ;;  %v543_v6 = vpop.permute.xlu0 %542 }
 0x22a   :  { %415 = vrot.lane.b32.xlu1 %v274_v37, %s1818_s23  ;;  %v619_v27 = vrot.slane %v275_v29, 1  ;;  %v849_v24 = vrot.slane %v275_v29, 2 }
 0x22c   :  { %v850_v9 = vsel %vm666_vm1, %v847_v1, %v849_v24 }
 0x22d   :  { %647 = vrot.lane.b32.xlu0 %v618_v10, %s1824_s27  ;;  %v594_v47 = vpop.permute.xlu0 %593 }
 0x22e   :  { %875 = vrot.lane.b32.xlu1 %v846_v53, %s1827_s17  ;;  %v909_v53 = vsel %vm896_vm3, %v2014_v4, %v316_v42 }
 0x22f   :  { %v925_v11 = vsel %vm912_vm4, %v909_v53, %v364_v61 }
 0x231   :  { %v1218_v12 = vpop.f32.mrf.mxu0  ;;  %495 = vrot.lane.b32.xlu0 %v2371_v33, %s1820_s12 }
 0x232   :  { %724 = vrot.lane.b32.xlu1 %v2358_v18, %s1826_s13  ;;  %v2937_v18 = vld [vmem:[%s3121_s4] ss:$0 sm:$0xff] }
 0x233   :  { %v1711_v19 = vpop.f32.mrf.mxu0  ;;  %v1219_v33 = vadd.f32 %v2937_v18, %v1218_v12  ;;  %v1214_v54 = vadd.f32 %v2937_v18, %v2896_v23  ;;  %v318_v23 = vpop.permute.xlu1 %317 }
 0x234   :  { %v941_v19 = vsel %vm928_vm5, %v925_v11, %v412_v0 }
 0x235   :  { %546 = vrot.lane.b32.xlu0 %v2566_v48, %s1821_s15  ;;  %v620_v48 = vsel %vm435_vm0, %v617_v50, %v619_v27  ;;  %v1277_v3 = vmax.f32 %v1219_v33, 0.0  ;;  %v1276_v45 = vmax.f32 %v1214_v54, 0.0  ;;  %v957_v27 = vsel %vm944_vm6, %v941_v19, %v492_v46 }
 0x236   :  { %775 = vrot.lane.b32.xlu1 %v2552_v38, %s1823_s26  ;;  %v848_v38 = vsel %vm666_vm1, %v845_v32, %v847_v1 }
 0x237   :  { %v366_v49 = vpop.permute.xlu1 %365 }
 0x239   :  { %597 = vrot.lane.b32.xlu0 %v2721_v52, %s1822_s20  ;;  %v1204_v52 = vadd.f32 %v2937_v18, %v2854_v15 }
 0x23a   :  { %826 = vrot.lane.b32.xlu1 %v2732_v8, %s1828_s24  ;;  %v1209_v8 = vadd.f32 %v2937_v18, %v1208_v36 }
 0x23b   :  { %v1274_v26 = vmax.f32 %v1204_v52, 0.0 }
 0x23c   :  { %v1275_v5 = vmax.f32 %v1209_v8, 0.0 }
 0x23d   :  { %649 = vrot.lane.b32.xlu0 %v620_v48, %s1824_s27  ;;  %v2952_v41 = vmax.f32 %v1274_v26, %v1277_v3 }
 0x23e   :  { %877 = vrot.lane.b32.xlu1 %v848_v38, %s1827_s17  ;;  %v973_v38 = vsel %vm960_vm7, %v957_v27, %v543_v6 }
 0x23f   :  { %v1330_v30 = vrot.slane %v2952_v41, 2  ;;  %v989_v8 = vsel %vm976_vm8, %v973_v38, %v594_v47 }
 0x241   :  { %v1223_v44 = vpop.f32.mrf.mxu0  ;;  %726 = vrot.lane.b32.xlu0 %v2424_v40, %s1826_s13  ;;  %v1299_v40 = vrot.slane %v2952_v41, 1 }
 0x242   :  { %v1224_v20 = vadd.f32 %v2937_v18, %v1223_v44  ;;  %777 = vrot.lane.b32.xlu1 %v2661_v51, %s1823_s26 }
 0x243   :  { %v1714_v2 = vpop.f32.mrf.mxu0 }
 0x244   :  { %v1278_v15 = vmax.f32 %v1224_v20, 0.0 }
 0x245   :  { %828 = vrot.lane.b32.xlu0 %v2754_v17, %s1828_s24 }
 0x246   :  { %v2957_v16 = vmax.f32 %v1275_v5, %v1278_v15  ;;  %879 = vrot.lane.b32.xlu1 %v850_v9, %s1827_s17 }
 0x248   :  { %v1300_v22 = vrot.slane %v2957_v16, 1  ;;  %v1331_v51 = vrot.slane %v2957_v16, 2 }
 0x24a   :  { %v1301_v55 = vsel %vm435_vm0, %v1299_v40, %v1300_v22  ;;  %v1332_v17 = vsel %vm666_vm1, %v1330_v30, %v1331_v51  ;;  %v910_v40 = vsel %vm896_vm3, %v2069_v28, %v318_v23 }
 0x24b   :  { %1312 = vrot.lane.b32.xlu0 %v1301_v55, %s1816_s21 }
 0x24f   :  { %1343 = vrot.lane.b32.xlu0 %v1332_v17, %s1817_s22 }
 0x25d   :  { %v1228_v13 = vpop.f32.mrf.mxu0 }
 0x25e   :  { %v1229_v31 = vadd.f32 %v2937_v18, %v1228_v13 }
 0x25f   :  { %v1717_v25 = vpop.f32.mrf.mxu0 }
 0x260   :  { %v1279_v14 = vmax.f32 %v1229_v31, 0.0 }
 0x262   :  { %v2981_v36 = vmax.f32 %v1276_v45, %v1279_v14 }
 0x264   :  { %v1302_v56 = vrot.slane %v2981_v36, 1  ;;  %v1333_v34 = vrot.slane %v2981_v36, 2 }
 0x266   :  { %v1303_v39 = vsel %vm435_vm0, %v1300_v22, %v1302_v56  ;;  %v1334_v63 = vsel %vm666_vm1, %v1331_v51, %v1333_v34  ;;  %v926_v51 = vsel %vm912_vm4, %v910_v40, %v366_v49 }
 0x267   :  { %1314 = vrot.lane.b32.xlu1 %v1303_v39, %s1816_s21 }
 0x26b   :  { %1345 = vrot.lane.b32.xlu1 %v1334_v63, %s1817_s22 }
 0x26d   :  { %v2993_v59 = vpop.f32.mrf.mxu0 }
 0x26f   :  { %v1720_v21 = vpop.f32.mrf.mxu0 }
 0x288   :  { %v2995_v37 = vpop.f32.mrf.mxu0  ;;  %v414_v50 = vpop.permute.xlu1 %413 }
 0x289   :  { %v942_v30 = vsel %vm928_vm5, %v926_v51, %v414_v50  ;;  %v1310_v51 = vrot.slane %v3143_v60, 1 }
 0x28a   :  { %v1723_v32 = vpop.f32.mrf.mxu0 }
 0x28b   :  { %v646_v58 = vpop.permute.xlu0 %645 }
 0x28c   :  { %v494_v10 = vpop.permute.xlu1 %493  ;;  %v1005_v4 = vsel %vm992_vm9, %v989_v8, %v646_v58 }
 0x28d   :  { %v958_v17 = vsel %vm944_vm6, %v942_v30, %v494_v10 }
 0x28f   :  { %v723_v7 = vpop.permute.xlu0 %722 }
 0x290   :  { %v320_v12 = vpop.permute.xlu1 %319  ;;  %v1021_v44 = vsel %vm1008_vm10, %v1005_v4, %v723_v7 }
 0x291   :  { %v911_v31 = vsel %vm896_vm3, %v2292_v43, %v320_v12 }
 0x293   :  { %v545_v29 = vpop.permute.xlu0 %544 }
 0x294   :  { %v774_v1 = vpop.permute.xlu1 %773  ;;  %v974_v62 = vsel %vm960_vm7, %v958_v17, %v545_v29 }
 0x295   :  { %v1037_v26 = vsel %vm1024_vm11, %v1021_v44, %v774_v1 }
 0x297   :  { %v368_v33 = vpop.permute.xlu0 %367 }
 0x298   :  { %v596_v48 = vpop.permute.xlu1 %595  ;;  %v927_v25 = vsel %vm912_vm4, %v911_v31, %v368_v33  ;;  %v1341_v31 = vrot.slane %v3143_v60, 2 }
 0x299   :  { %v990_v35 = vsel %vm976_vm8, %v974_v62, %v596_v48 }
 0x29b   :  { %v825_v52 = vpop.permute.xlu0 %824 }
 0x29c   :  { %v416_v3 = vpop.permute.xlu1 %415  ;;  %v1053_v24 = vsel %vm1040_vm12, %v1037_v26, %v825_v52  ;;  %v1239_v52 = vadd.f32 %v2937_v18, %v2995_v37 }
 0x29d   :  { %v943_v39 = vsel %vm928_vm5, %v927_v25, %v416_v3  ;;  %v1234_v3 = vadd.f32 %v2937_v18, %v2993_v59 }
 0x29e   :  { %v1281_v26 = vmax.f32 %v1239_v52, 0.0 }
 0x29f   :  { %v648_v20 = vpop.permute.xlu0 %647 }
 0x2a0   :  { %v876_v2 = vpop.permute.xlu1 %875  ;;  %v1006_v28 = vsel %vm992_vm9, %v990_v35, %v648_v20 }
 0x2a1   :  { %v1069_v5 = vsel %vm1056_vm13, %v1053_v24, %v876_v2 }
 0x2a2   :  { %1737 = vmatmul.mubr.msk.f32.gmra.mxu1 %vm1091_vm14, %v1069_v5  ;;  %v1280_v5 = vmax.f32 %v1234_v3, 0.0 }
 0x2a3   :  { %v496_v15 = vpop.permute.xlu0 %495  ;;  %1739 = vmatprep.mubr.msk.f32.mxu1 %vm1825_vm2, %v3143_v60 }
 0x2a4   :  { %v725_v9 = vpop.permute.xlu1 %724  ;;  %v959_v42 = vsel %vm944_vm6, %v943_v39, %v496_v15 }
 0x2a5   :  { %v1022_v45 = vsel %vm1008_vm10, %v1006_v28, %v725_v9 }
 0x2a7   :  { %v547_v22 = vpop.permute.xlu0 %546 }
 0x2a8   :  { %v776_v55 = vpop.permute.xlu1 %775  ;;  %v975_v46 = vsel %vm960_vm7, %v959_v42, %v547_v22 }
 0x2a9   :  { %v1038_v63 = vsel %vm1024_vm11, %v1022_v45, %v776_v55 }
 0x2ab   :  { %v598_v57 = vpop.permute.xlu0 %597 }
 0x2ac   :  { %v1243_v54 = vpop.f32.mrf.mxu0  ;;  %v827_v13 = vpop.permute.xlu1 %826  ;;  %v991_v23 = vsel %vm976_vm8, %v975_v46, %v598_v57 }
 0x2ad   :  { %v1054_v61 = vsel %vm1040_vm12, %v1038_v63, %v827_v13  ;;  %v1244_v4 = vadd.f32 %v2937_v18, %v1243_v54 }
 0x2ae   :  { %v1726_v14 = vpop.f32.mrf.mxu0 }
 0x2af   :  { %v650_v21 = vpop.permute.xlu0 %649  ;;  %v1282_v15 = vmax.f32 %v1244_v4, 0.0 }
 0x2b0   :  { %v878_v0 = vpop.permute.xlu1 %877  ;;  %v1007_v6 = vsel %vm992_vm9, %v991_v23, %v650_v21 }
 0x2b1   :  { %v1070_v43 = vsel %vm1056_vm13, %v1054_v61, %v878_v0 }
 0x2b2   :  { %1740 = vmatmul.mubr.msk.f32.gmra.mxu1 %vm1091_vm14, %v1070_v43 }
 0x2b3   :  { %v727_v49 = vpop.permute.xlu0 %726  ;;  %1742 = vmatprep.mubr.msk.f32.mxu1 %vm1825_vm2, %v3143_v60 }
 0x2b4   :  { %v1023_v47 = vsel %vm1008_vm10, %v1007_v6, %v727_v49  ;;  %v778_v50 = vpop.permute.xlu1 %777 }
 0x2b5   :  { %v1039_v32 = vsel %vm1024_vm11, %v1023_v47, %v778_v50 }
 0x2b7   :  { %v829_v58 = vpop.permute.xlu0 %828 }
 0x2b8   :  { %v1055_v10 = vsel %vm1040_vm12, %v1039_v32, %v829_v58  ;;  %v880_v53 = vpop.permute.xlu1 %879 }
 0x2b9   :  { %v1071_v7 = vsel %vm1056_vm13, %v1055_v10, %v880_v53 }
 0x2ba   :  { %1743 = vmatmul.mubr.msk.f32.gmra.mxu1 %vm1091_vm14, %v1071_v7 }
 0x2bd   :  { %v1248_v12 = vpop.f32.mrf.mxu0  ;;  %v1313_v11 = vpop.permute.xlu0 %1312 }
 0x2be   :  { %v1361_v29 = vsel %vm896_vm3, %v2952_v41, %v1313_v11  ;;  %v1249_v8 = vadd.f32 %v2937_v18, %v1248_v12 }
 0x2bf   :  { %v1729_v19 = vpop.f32.mrf.mxu0 }
 0x2c0   :  { %v1283_v20 = vmax.f32 %v1249_v8, 0.0 }
 0x2c1   :  { %v1344_v1 = vpop.permute.xlu0 %1343 }
 0x2c2   :  { %v1367_v27 = vsel %vm912_vm4, %v1361_v29, %v1344_v1  ;;  %v1289_v22 = vmax.f32 %v1280_v5, %v1283_v20 }
 0x2c3   :  { %1751 = vmatprep.mubr.msk.f32.mxu1 %vm928_vm5, %v1367_v27 }
 0x2c4   :  { %v1253_v33 = vpop.f32.mrf.mxu1  ;;  %v1304_v59 = vrot.slane %v1289_v22, 1 }
 0x2c5   :  { %v1254_v38 = vadd.f32 %v2937_v18, %v1253_v33 }
 0x2c6   :  { %v1732_v48 = vpop.f32.mrf.mxu1  ;;  %v1305_v13 = vsel %vm435_vm0, %v1302_v56, %v1304_v59 }
 0x2c7   :  { %v1284_v41 = vmax.f32 %v1254_v38, 0.0  ;;  %v1627_v48 = vld [vmem:[%s3123_s6] ss:$0 sm:$0xff] }
 0x2c9   :  { %v1290_v9 = vmax.f32 %v1281_v26, %v1284_v41 }
 0x2cb   :  { %v1306_v55 = vrot.slane %v1290_v9, 1  ;;  %v1337_v57 = vrot.slane %v1290_v9, 2 }
 0x2cc   :  { %v1258_v44 = vpop.f32.mrf.mxu1 }
 0x2cd   :  { %v1259_v24 = vadd.f32 %v2937_v18, %v1258_v44  ;;  %v1335_v18 = vrot.slane %v1289_v22, 2  ;;  %v1307_v54 = vsel %vm435_vm0, %v1304_v59, %v1306_v55 }
 0x2ce   :  { %v1735_v2 = vpop.f32.mrf.mxu1 }
 0x2cf   :  { %v1285_v40 = vmax.f32 %v1259_v24, 0.0  ;;  %v1338_v14 = vsel %vm666_vm1, %v1335_v18, %v1337_v57  ;;  %v1336_v39 = vsel %vm666_vm1, %v1333_v34, %v1335_v18 }
 0x2d1   :  { %v1291_v37 = vmax.f32 %v1282_v15, %v1285_v40  ;;  %v1507_v15 = vld [vmem:[%s3124_s7 + $0x10] sm:$0xff] }
 0x2d3   :  { %v1308_v30 = vrot.slane %v1291_v37, 1  ;;  %v1339_v28 = vrot.slane %v1291_v37, 2 }
 0x2d5   :  { %v1311_v17 = vsel %vm435_vm0, %v1308_v30, %v1310_v51  ;;  %v1309_v62 = vsel %vm435_vm0, %v1306_v55, %v1308_v30  ;;  %v1342_v56 = vsel %vm666_vm1, %v1339_v28, %v1341_v31  ;;  %v1340_v21 = vsel %vm666_vm1, %v1337_v57, %v1339_v28  ;;  %v1506_v51 = vld [vmem:[%s3124_s7 + $0x8] sm:$0xff]  ;;  %v1511_v57 = vld [vmem:[%s3125_s8] sm:$0x3] }
 0x2d6   :  { %1322 = vrot.lane.b32.xlu1 %v1311_v17, %s1816_s21  ;;  %1320 = vrot.lane.b32.xlu0 %v1309_v62, %s1816_s21  ;;  %v1505_v17 = vld [vmem:[%s3124_s7] sm:$0xff]  ;;  %vm1603_vm0 = vcmask 1024  }
 0x2d9   :  { %v1315_v35 = vpop.permute.xlu1 %1314 }
 0x2da   :  { %1318 = vrot.lane.b32.xlu1 %v1307_v54, %s1816_s21  ;;  %1316 = vrot.lane.b32.xlu0 %v1305_v13, %s1816_s21  ;;  %v1362_v25 = vsel %vm896_vm3, %v2957_v16, %v1315_v35  ;;  %v15_v35 = vstv %s3126_s9 }
 0x2db   :  { %16 = vst [vmem:[#allocation2] sm:$0x1] %v15_v35 }
 0x2dd   :  { %v1346_v45 = vpop.permute.xlu1 %1345 }
 0x2de   :  { %v1368_v63 = vsel %vm912_vm4, %v1362_v25, %v1346_v45  ;;  %1349 = vrot.lane.b32.xlu1 %v1338_v14, %s1817_s22  ;;  %1347 = vrot.lane.b32.xlu0 %v1336_v39, %s1817_s22 }
 0x2df   :  { %1752 = vmatmul.mubr.msk.f32.vlgmr.msra.gmra.mxu1 %vm928_vm5, %v1368_v63 }
 0x2e2   :  { %1353 = vrot.lane.b32.xlu1 %v1342_v56, %s1817_s22  ;;  %1351 = vrot.lane.b32.xlu0 %v1340_v21, %s1817_s22  ;;  %v1635_v28 = vld [vmem:[#allocation2] ss:$0 sm:$0xff] }
 0x348   :  { %v1323_v16 = vpop.permute.xlu1 %1322  ;;  %v1321_v42 = vpop.permute.xlu0 %1320 }
 0x349   :  { %v1366_v47 = vsel %vm896_vm3, %v1291_v37, %v1323_v16  ;;  %v1365_v50 = vsel %vm896_vm3, %v1290_v9, %v1321_v42 }
 0x34c   :  { %v1319_v61 = vpop.permute.xlu1 %1318  ;;  %v1317_v34 = vpop.permute.xlu0 %1316 }
 0x34d   :  { %v1364_v0 = vsel %vm896_vm3, %v1289_v22, %v1319_v61  ;;  %v1363_v46 = vsel %vm896_vm3, %v2981_v36, %v1317_v34 }
 0x350   :  { %v1350_v43 = vpop.permute.xlu1 %1349  ;;  %v1348_v23 = vpop.permute.xlu0 %1347 }
 0x351   :  { %v1370_v6 = vsel %vm912_vm4, %v1364_v0, %v1350_v43  ;;  %v1369_v49 = vsel %vm912_vm4, %v1363_v46, %v1348_v23 }
 0x352   :  { %1754 = vmatprep.mubr.msk.f32.mxu1 %vm928_vm5, %v1369_v49 }
 0x353   :  { %1755 = vmatmul.mubr.msk.f32.gmra.mxu1 %vm928_vm5, %v1370_v6 }
 0x354   :  { %v1354_v32 = vpop.permute.xlu1 %1353  ;;  %v1352_v58 = vpop.permute.xlu0 %1351 }
 0x355   :  { %v1372_v10 = vsel %vm912_vm4, %v1366_v47, %v1354_v32  ;;  %v1371_v36 = vsel %vm912_vm4, %v1365_v50, %v1352_v58 }
 0x356   :  { %1757 = vmatprep.mubr.msk.f32.mxu1 %vm928_vm5, %v1371_v36 }
 0x357   :  { %1758 = vmatmul.mubr.msk.f32.gmra.mxu1 %vm928_vm5, %v1372_v10 }
 0x358   :  { %1766 = vmatprep.mubr.msk.f32.mxu1 %vm1825_vm2, %v3143_v60 }
 0x362   :  { %v1263_v53 = vpop.f32.mrf.mxu1 }
 0x364   :  { %v1738_v7 = vpop.f32.mrf.mxu1 }
 0x372   :  { %v1267_v12 = vpop.f32.mrf.mxu1 }
 0x374   :  { %v1741_v11 = vpop.f32.mrf.mxu1 }
 0x37a   :  { %v1271_v19 = vpop.f32.mrf.mxu1 }
 0x37c   :  { %v1744_v29 = vpop.f32.mrf.mxu1 }
 0x39f   :  { %v1753_v1 = vpop.f32.mrf.mxu1 }
 0x3a0   :  { %v1473_v4 = vadd.f32 %v1753_v1, %v1627_v48 }
 0x3a1   :  { %v1467_v27 = vpop.f32.mrf.mxu1 }
 0x3a2   :  { %v1468_v41 = vadd.f32 %v1627_v48, %v1467_v27  ;;  %v1497_v9 = vmax.f32 %v1473_v4, 0.0 }
 0x3a4   :  { %v1496_v40 = vmax.f32 %v1468_v41, 0.0 }
 0x413   :  { %v1756_v33 = vpop.f32.mrf.mxu1 }
 0x414   :  { %v1483_v52 = vadd.f32 %v1756_v33, %v1627_v48 }
 0x415   :  { %v1477_v38 = vpop.f32.mrf.mxu1 }
 0x416   :  { %v1478_v8 = vadd.f32 %v1627_v48, %v1477_v38  ;;  %v1499_v20 = vmax.f32 %v1483_v52, 0.0 }
 0x417   :  { %v1759_v3 = vpop.f32.mrf.mxu1 }
 0x418   :  { %v1493_v44 = vadd.f32 %v1759_v3, %v1627_v48  ;;  %v1498_v24 = vmax.f32 %v1478_v8, 0.0  ;;  %v1502_v55 = vmax.f32 %v1496_v40, %v1499_v20 }
 0x419   :  { %v1487_v26 = vpop.f32.mrf.mxu1 }
 0x41a   :  { %v1501_v2 = vmax.f32 %v1493_v44, 0.0  ;;  %v1488_v5 = vadd.f32 %v1627_v48, %v1487_v26  ;;  %v1508_v18 = vmul.f32 %v1505_v17, %v1502_v55 }
 0x41c   :  { %v1504_v22 = vmax.f32 %v1498_v24, %v1501_v2  ;;  %v1500_v37 = vmax.f32 %v1488_v5, 0.0 }
 0x41e   :  { %v1510_v30 = vmul.f32 %v1507_v15, %v1504_v22  ;;  %v1503_v59 = vmax.f32 %v1497_v9, %v1500_v37 }
 0x420   :  { %v1509_v62 = vmul.f32 %v1506_v51, %v1503_v59  ;;  %1761 = vmatpush3.msra.mxu1 %v1510_v30 }
 0x421   :  { %1762 = vmatprep.subr.mxu1 %v3143_v60 }
 0x422   :  { %1763 = vmatpush3.msra.mxu1 %v1509_v62 }
 0x423   :  { %1764 = vmatprep.subr.mxu1 %v3143_v60 }
 0x424   :  { %1765 = vmatpush3.msra.mxu1 %v1508_v18 }
 0x425   :  { %1767 = vmatmul.mubr.msk.f32.vlgmr.msra.gmra.mxu1 %vm928_vm5, %v1511_v57 }
 0x4e5   :  { %v1581_v54 = vpop.f32.mrf.mxu1 }
 0x4e6   :  { %v1586_v13 = vsel %vm1585_vm15, %v1581_v54, 0.0 }
 0x4e7   :  { %v1768_v31 = vpop.f32.mrf.mxu1  ;;  %1587 = vadd.xlane.f32.xlu0 %v1586_v13 }
 0x570   :  { %v1588_v25 = vpop.xlane.xlu0 %1587 }
 0x571   :  { %v1596_v45 = vadd.f32 %v1635_v28, %v1588_v25 }
 0x573   :  { %v1597_v14 = vsub.f32 0.0, %v1596_v45 }
 0x575   :  { %v1598_v39 = vmul.f32 1.442695, %v1597_v14 }
 0x577   :  { %1809 = vpow2.f32 %v1598_v39 }
 0x584   :  { %v1810_v60 = vpop.eup %1809 }
 0x585   :  { %v1600_v63 = vadd.f32 1.0, %v1810_v60 }
 0x587   :  { %1811 = vrcp.f32 %v1600_v63 }
 0x594   :  { %v1812_v56 = vpop.eup %1811 }
 0x595   :  { %1604 = vst.msk [vmem:[%s3127_s10] sm:$0x3] %vm1603_vm0, %v1812_v56 }

</bundles_post_ra>
